<compile_context>
chip_gen: v7x
topology: tpu7x:2x2x1
jax: 0.10.0
libtpu: 0.0.40
codegen_flags: <defaults>
</compile_context>

<pallas_src>
import functools

import jax
import jax.numpy as jnp
import numpy as np
from jax.experimental import pallas as pl
from jax.experimental.pallas import tpu as pltpu


def _routing_kernel(x_ref, w_ref, out_ref, *, num_iterations, compute_dtype):
    """One grid step: one (batch tile, output capsule) pair.

    x_ref:   (R, Cin, Bb)       VMEM  -- batch tile, batch on the lane axis
    w_ref:   (1, R, Cin, Cout)  VMEM  -- this capsule's routing weights
    out_ref: (1, Cout, Bb)      VMEM
    """
    x = x_ref[...]                                  # (R, Cin, Bb)
    w = w_ref[0]                                    # (R, Cin, Cout)
    if x.dtype != compute_dtype:
        x = x.astype(compute_dtype)
        w = w.astype(compute_dtype)

    # priors[r, d, b] = sum_c w[r, c, d] * x[r, c, b]
    # R-batched matmul on the MXU; no 4-D intermediate is materialized.
    priors = jnp.einsum("rcd,rcb->rdb", w, x,
                        preferred_element_type=jnp.float32)   # (R, Cout, Bb)

    r, cout, bb = priors.shape

    # Routing logits: one scalar per (route node, batch element).  This is
    # exact: PyTorch's logits start at zero and only ever receive a delta that
    # is constant over the Cout axis, so they stay constant over Cout.
    logits = jnp.zeros((r, bb), jnp.float32)

    outputs = jnp.zeros((cout, bb), jnp.float32)
    for it in range(num_iterations):                # static trip count
        # Softmax over route nodes (axis 0); denominator via EUP reciprocal.
        m = jnp.max(logits, axis=0, keepdims=True)
        e = jnp.exp(logits - m)
        probs = e * pl.reciprocal(jnp.sum(e, axis=0, keepdims=True),
                                  approx=True)                # (R, Bb)

        # s[d, b] = sum_r probs[r, b] * priors[r, d, b]
        s = jnp.sum(priors * probs[:, None, :], axis=0)       # (Cout, Bb)

        # squash over the capsule (Cout) axis:
        #   squash(s) = (|s|^2 / (1 + |s|^2)) * s / |s|
        sq = jnp.sum(s * s, axis=0, keepdims=True)            # (1, Bb)
        outputs = (s * (sq * jax.lax.rsqrt(sq))
                   * pl.reciprocal(1.0 + sq, approx=True))    # (Cout, Bb)

        if it != num_iterations - 1:
            # delta[r, b] = sum_d priors[r, d, b] * outputs[d, b]
            logits = logits + jnp.sum(priors * outputs[None, :, :], axis=1)

    out_ref[0] = outputs.astype(out_ref.dtype)


def capsule_layer_forward(x, route_weights, num_iterations, *,
                          block_b=None, compute_dtype=jnp.float32):
    """Pallas implementation of CapsuleLayer.forward (routing branch).

    x:             (B, R, Cin) float32
    route_weights: (NC, R, Cin, Cout) float32
    returns:       (NC, B, 1, 1, Cout) float32   (same as PyTorch)
    """
    nc, r, cin, cout = route_weights.shape
    b = x.shape[0]
    assert x.shape == (b, r, cin), (x.shape, (b, r, cin))

    if block_b is None:
        block_b = b                       # small shapes: a single batch tile
    assert b % block_b == 0, "block_b must divide the batch"
    # block_b is the lane dim of the x / out blocks: full B or 128-aligned.
    assert block_b == b or block_b % 128 == 0
    nbt = b // block_b

    # Put batch on the minor (lane) axis: priors / probs / outputs and the
    # final store are lane-dense once block_b is a multiple of 128, and x is
    # stored without the 16x lane padding its natural Cin=8 minor dim causes.
    xt = jnp.transpose(x, (1, 2, 0))      # (R, Cin, B)

    kernel = functools.partial(_routing_kernel,
                               num_iterations=num_iterations,
                               compute_dtype=compute_dtype)

    out = pl.pallas_call(
        kernel,
        out_shape=jax.ShapeDtypeStruct((nc, cout, b), jnp.float32),
        grid_spec=pltpu.PrefetchScalarGridSpec(
            num_scalar_prefetch=0,
            # Capsules innermost: the x tile (index depends only on ib) is
            # fetched once per batch tile, not once per capsule; only the
            # small per-capsule weight block streams every step.
            grid=(nbt, nc),
            in_specs=[
                pl.BlockSpec((r, cin, block_b), lambda ib, ic: (0, 0, ib)),
                pl.BlockSpec((1, r, cin, cout), lambda ib, ic: (ic, 0, 0, 0)),
            ],
            out_specs=pl.BlockSpec((1, cout, block_b),
                                   lambda ib, ic: (ic, 0, ib)),
        ),
        compiler_params=pltpu.CompilerParams(
            # Independent (batch tile, capsule) pairs -> both axes may be
            # split across TensorCores (v7x megacore).
            dimension_semantics=("parallel", "parallel"),
            # Explicit headroom; fits 64 MiB-VMEM chips with block_b <= 128.
            vmem_limit_bytes=48 * 1024 * 1024,
        ),
    )(xt, route_weights)

    # (NC, Cout, B) -> (NC, B, 1, 1, Cout), matching the PyTorch forward.
    return jnp.transpose(out, (0, 2, 1)).reshape(nc, b, 1, 1, cout)


def capsule_layer_reference(x, route_weights, num_iterations):
    """Pure-JAX reference mirroring the PyTorch code shape-for-shape."""
    priors = jnp.matmul(x[None, :, :, None, :],
                        route_weights[:, None, :, :, :])  # (NC, B, R, 1, Cout)

    def squash(t):
        sq = jnp.sum(t * t, axis=-1, keepdims=True)
        return (sq / (1.0 + sq)) * t / jnp.sqrt(sq)

    logits = jnp.zeros_like(priors)
    outputs = None
    for i in range(num_iterations):
        probs = jax.nn.softmax(logits, axis=2)
        outputs = squash(jnp.sum(probs * priors, axis=2, keepdims=True))
        if i != num_iterations - 1:
            logits = logits + jnp.sum(priors * outputs, axis=-1, keepdims=True)
    return outputs  # (NC, B, 1, 1, Cout)


if __name__ == "__main__":
    # Small shapes consistent with the routing branch of CapsuleLayer.
    batch = 2
    num_capsules = 4
    num_route_nodes = 16
    in_channels = 8
    out_channels = 16
    num_iterations = 3

    key = jax.random.PRNGKey(0)
    kx, kw = jax.random.split(key)
    # input to the routing layer: (B, num_route_nodes, in_channels)
    x = jax.random.normal(kx, (batch, num_route_nodes, in_channels),
                          jnp.float32)
    # deterministic "torch.randn" analogue for the parameter
    route_weights = jax.random.normal(
        kw, (num_capsules, num_route_nodes, in_channels, out_channels),
        jnp.float32)

    out = capsule_layer_forward(x, route_weights, num_iterations)
    out = jax.block_until_ready(out)

    ref = capsule_layer_reference(x, route_weights, num_iterations)
    # Tolerance covers the TPU MXU default (bf16-pass) f32 matmul in both the
    # kernel and the XLA reference, plus the approximate EUP reciprocals.
    np.testing.assert_allclose(np.asarray(out), np.asarray(ref),
                               rtol=2e-2, atol=2e-2)

    print("KERNEL_OK")
</pallas_src>

<mosaic_0001>
module attributes {stable_mosaic.version = 11 : i64} {
  func.func @_routing_kernel(%arg0: i32, %arg1: i32, %arg2: memref<16x8x2xf32, #tpu.memory_space<vmem>>, %arg3: memref<1x16x8x16xf32, #tpu.memory_space<vmem>>, %arg4: memref<1x16x2xf32, #tpu.memory_space<vmem>>) attributes {dimension_semantics = [#tpu.dimension_semantics<parallel>, #tpu.dimension_semantics<parallel>], iteration_bounds = array<i64: 1, 4>, scalar_prefetch = 0 : i64, scratch_operands = 0 : i64, tpu.core_type = #tpu.core_type<tc>, window_params = [{transform_indices = @transform_0, window_bounds = array<i64: 16, 8, 2>}, {transform_indices = @transform_1, window_bounds = array<i64: 1, 16, 8, 16>}, {transform_indices = @transform_2, window_bounds = array<i64: 1, 16, 2>}]} {
    %c0 = arith.constant 0 : index
    %c0_0 = arith.constant 0 : index
    %c0_1 = arith.constant 0 : index
    %0 = vector.load %arg2[%c0, %c0_0, %c0_1] : memref<16x8x2xf32, #tpu.memory_space<vmem>>, vector<16x8x2xf32>
    %c0_2 = arith.constant 0 : index
    %c0_3 = arith.constant 0 : index
    %c0_4 = arith.constant 0 : index
    %c0_5 = arith.constant 0 : index
    %1 = vector.load %arg3[%c0_2, %c0_3, %c0_4, %c0_5] : memref<1x16x8x16xf32, #tpu.memory_space<vmem>>, vector<1x16x8x16xf32>
    %2 = vector.shape_cast %1 : vector<1x16x8x16xf32> to vector<16x8x16xf32>
    "tpu.trace_start"() <{level = 10 : i32, message = "rcd,rcb->rdb"}> : () -> ()
    %cst = arith.constant dense<0.000000e+00> : vector<16x16x2xf32>
    %3 = tpu.matmul %2, %0, %cst {dimension_numbers = #tpu.dot_dimension_numbers<[1], [1], [2], [2], [0, 0, 0, 2, 1, 2], [0], [0]>} : vector<16x8x16xf32>, vector<16x8x2xf32>, vector<16x16x2xf32> -> vector<16x16x2xf32>
    %cst_6 = arith.constant 0.000000e+00 : f32
    "tpu.trace_stop"() : () -> ()
    %4 = vector.broadcast %cst_6 : f32 to vector<16x2xf32>
    %cst_7 = arith.constant dense<0xFF800000> : vector<2xf32>
    %5 = vector.multi_reduction <maximumf>, %4, %cst_7 [0] : vector<16x2xf32> to vector<2xf32>
    %6 = vector.shape_cast %5 : vector<2xf32> to vector<1x2xf32>
    %7 = vector.broadcast %6 : vector<1x2xf32> to vector<16x2xf32>
    %8 = arith.subf %4, %7 : vector<16x2xf32>
    %9 = math.exp %8 : vector<16x2xf32>
    %cst_8 = arith.constant dense<0.000000e+00> : vector<2xf32>
    %10 = vector.multi_reduction <add>, %9, %cst_8 [0] : vector<16x2xf32> to vector<2xf32>
    %11 = vector.shape_cast %10 : vector<2xf32> to vector<1x2xf32>
    %12 = tpu.reciprocal %11 {approx = true} : vector<1x2xf32> -> vector<1x2xf32>
    %13 = vector.broadcast %12 : vector<1x2xf32> to vector<16x2xf32>
    %14 = arith.mulf %9, %13 : vector<16x2xf32>
    %15 = vector.shape_cast %14 : vector<16x2xf32> to vector<16x1x2xf32>
    %16 = vector.broadcast %15 : vector<16x1x2xf32> to vector<16x16x2xf32>
    %17 = arith.mulf %3, %16 : vector<16x16x2xf32>
    %cst_9 = arith.constant dense<0.000000e+00> : vector<16x2xf32>
    %18 = vector.multi_reduction <add>, %17, %cst_9 [0] : vector<16x16x2xf32> to vector<16x2xf32>
    %19 = arith.mulf %18, %18 : vector<16x2xf32>
    %cst_10 = arith.constant dense<0.000000e+00> : vector<2xf32>
    %20 = vector.multi_reduction <add>, %19, %cst_10 [0] : vector<16x2xf32> to vector<2xf32>
    %21 = vector.shape_cast %20 : vector<2xf32> to vector<1x2xf32>
    %22 = math.rsqrt %21 : vector<1x2xf32>
    %23 = arith.mulf %21, %22 : vector<1x2xf32>
    %24 = vector.broadcast %23 : vector<1x2xf32> to vector<16x2xf32>
    %25 = arith.mulf %18, %24 : vector<16x2xf32>
    %cst_11 = arith.constant 1.000000e+00 : f32
    %26 = vector.broadcast %cst_11 : f32 to vector<1x2xf32>
    %27 = arith.addf %26, %21 : vector<1x2xf32>
    %28 = tpu.reciprocal %27 {approx = true} : vector<1x2xf32> -> vector<1x2xf32>
    %29 = vector.broadcast %28 : vector<1x2xf32> to vector<16x2xf32>
    %30 = arith.mulf %25, %29 : vector<16x2xf32>
    %31 = vector.shape_cast %30 : vector<16x2xf32> to vector<1x16x2xf32>
    %32 = vector.broadcast %31 : vector<1x16x2xf32> to vector<16x16x2xf32>
    %33 = arith.mulf %3, %32 : vector<16x16x2xf32>
    %cst_12 = arith.constant dense<0.000000e+00> : vector<16x2xf32>
    %34 = vector.multi_reduction <add>, %33, %cst_12 [1] : vector<16x16x2xf32> to vector<16x2xf32>
    %35 = arith.addf %4, %34 : vector<16x2xf32>
    %cst_13 = arith.constant dense<0xFF800000> : vector<2xf32>
    %36 = vector.multi_reduction <maximumf>, %35, %cst_13 [0] : vector<16x2xf32> to vector<2xf32>
    %37 = vector.shape_cast %36 : vector<2xf32> to vector<1x2xf32>
    %38 = vector.broadcast %37 : vector<1x2xf32> to vector<16x2xf32>
    %39 = arith.subf %35, %38 : vector<16x2xf32>
    %40 = math.exp %39 : vector<16x2xf32>
    %cst_14 = arith.constant dense<0.000000e+00> : vector<2xf32>
    %41 = vector.multi_reduction <add>, %40, %cst_14 [0] : vector<16x2xf32> to vector<2xf32>
    %42 = vector.shape_cast %41 : vector<2xf32> to vector<1x2xf32>
    %43 = tpu.reciprocal %42 {approx = true} : vector<1x2xf32> -> vector<1x2xf32>
    %44 = vector.broadcast %43 : vector<1x2xf32> to vector<16x2xf32>
    %45 = arith.mulf %40, %44 : vector<16x2xf32>
    %46 = vector.shape_cast %45 : vector<16x2xf32> to vector<16x1x2xf32>
    %47 = vector.broadcast %46 : vector<16x1x2xf32> to vector<16x16x2xf32>
    %48 = arith.mulf %3, %47 : vector<16x16x2xf32>
    %cst_15 = arith.constant dense<0.000000e+00> : vector<16x2xf32>
    %49 = vector.multi_reduction <add>, %48, %cst_15 [0] : vector<16x16x2xf32> to vector<16x2xf32>
    %50 = arith.mulf %49, %49 : vector<16x2xf32>
    %cst_16 = arith.constant dense<0.000000e+00> : vector<2xf32>
    %51 = vector.multi_reduction <add>, %50, %cst_16 [0] : vector<16x2xf32> to vector<2xf32>
    %52 = vector.shape_cast %51 : vector<2xf32> to vector<1x2xf32>
    %53 = math.rsqrt %52 : vector<1x2xf32>
    %54 = arith.mulf %52, %53 : vector<1x2xf32>
    %55 = vector.broadcast %54 : vector<1x2xf32> to vector<16x2xf32>
    %56 = arith.mulf %49, %55 : vector<16x2xf32>
    %cst_17 = arith.constant 1.000000e+00 : f32
    %57 = vector.broadcast %cst_17 : f32 to vector<1x2xf32>
    %58 = arith.addf %57, %52 : vector<1x2xf32>
    %59 = tpu.reciprocal %58 {approx = true} : vector<1x2xf32> -> vector<1x2xf32>
    %60 = vector.broadcast %59 : vector<1x2xf32> to vector<16x2xf32>
    %61 = arith.mulf %56, %60 : vector<16x2xf32>
    %62 = vector.shape_cast %61 : vector<16x2xf32> to vector<1x16x2xf32>
    %63 = vector.broadcast %62 : vector<1x16x2xf32> to vector<16x16x2xf32>
    %64 = arith.mulf %3, %63 : vector<16x16x2xf32>
    %cst_18 = arith.constant dense<0.000000e+00> : vector<16x2xf32>
    %65 = vector.multi_reduction <add>, %64, %cst_18 [1] : vector<16x16x2xf32> to vector<16x2xf32>
    %66 = arith.addf %35, %65 : vector<16x2xf32>
    %cst_19 = arith.constant dense<0xFF800000> : vector<2xf32>
    %67 = vector.multi_reduction <maximumf>, %66, %cst_19 [0] : vector<16x2xf32> to vector<2xf32>
    %68 = vector.shape_cast %67 : vector<2xf32> to vector<1x2xf32>
    %69 = vector.broadcast %68 : vector<1x2xf32> to vector<16x2xf32>
    %70 = arith.subf %66, %69 : vector<16x2xf32>
    %71 = math.exp %70 : vector<16x2xf32>
    %cst_20 = arith.constant dense<0.000000e+00> : vector<2xf32>
    %72 = vector.multi_reduction <add>, %71, %cst_20 [0] : vector<16x2xf32> to vector<2xf32>
    %73 = vector.shape_cast %72 : vector<2xf32> to vector<1x2xf32>
    %74 = tpu.reciprocal %73 {approx = true} : vector<1x2xf32> -> vector<1x2xf32>
    %75 = vector.broadcast %74 : vector<1x2xf32> to vector<16x2xf32>
    %76 = arith.mulf %71, %75 : vector<16x2xf32>
    %77 = vector.shape_cast %76 : vector<16x2xf32> to vector<16x1x2xf32>
    %78 = vector.broadcast %77 : vector<16x1x2xf32> to vector<16x16x2xf32>
    %79 = arith.mulf %3, %78 : vector<16x16x2xf32>
    %cst_21 = arith.constant dense<0.000000e+00> : vector<16x2xf32>
    %80 = vector.multi_reduction <add>, %79, %cst_21 [0] : vector<16x16x2xf32> to vector<16x2xf32>
    %81 = arith.mulf %80, %80 : vector<16x2xf32>
    %cst_22 = arith.constant dense<0.000000e+00> : vector<2xf32>
    %82 = vector.multi_reduction <add>, %81, %cst_22 [0] : vector<16x2xf32> to vector<2xf32>
    %83 = vector.shape_cast %82 : vector<2xf32> to vector<1x2xf32>
    %84 = math.rsqrt %83 : vector<1x2xf32>
    %85 = arith.mulf %83, %84 : vector<1x2xf32>
    %86 = vector.broadcast %85 : vector<1x2xf32> to vector<16x2xf32>
    %87 = arith.mulf %80, %86 : vector<16x2xf32>
    %cst_23 = arith.constant 1.000000e+00 : f32
    %88 = vector.broadcast %cst_23 : f32 to vector<1x2xf32>
    %89 = arith.addf %88, %83 : vector<1x2xf32>
    %90 = tpu.reciprocal %89 {approx = true} : vector<1x2xf32> -> vector<1x2xf32>
    %91 = vector.broadcast %90 : vector<1x2xf32> to vector<16x2xf32>
    %92 = arith.mulf %87, %91 : vector<16x2xf32>
    %c0_24 = arith.constant 0 : index
    %c0_25 = arith.constant 0 : index
    %c0_26 = arith.constant 0 : index
    %93 = vector.load %arg4[%c0_24, %c0_25, %c0_26] : memref<1x16x2xf32, #tpu.memory_space<vmem>>, vector<1x16x2xf32>
    %94 = vector.shape_cast %93 : vector<1x16x2xf32> to vector<16x2xf32>
    %95 = vector.shape_cast %92 : vector<16x2xf32> to vector<1x16x2xf32>
    tpu.vector_store %arg4[%c0_24, %c0_25, %c0_26], %95 {strides = array<i32>} : memref<1x16x2xf32, #tpu.memory_space<vmem>>, vector<1x16x2xf32>,
    return
  }
  func.func @transform_0(%arg0: i32, %arg1: i32) -> (i32, i32, i32) {
    %c0_i32 = arith.constant 0 : i32
    %c0_i32_0 = arith.constant 0 : i32
    %c0_i32_1 = arith.constant 0 : i32
    return %c0_i32, %c0_i32_0, %arg0 : i32, i32, i32
  }
  func.func @transform_1(%arg0: i32, %arg1: i32) -> (i32, i32, i32, i32) {
    %c0_i32 = arith.constant 0 : i32
    %c0_i32_0 = arith.constant 0 : i32
    %c0_i32_1 = arith.constant 0 : i32
    %c0_i32_2 = arith.constant 0 : i32
    return %arg1, %c0_i32, %c0_i32_0, %c0_i32_1 : i32, i32, i32, i32
  }
  func.func @transform_2(%arg0: i32, %arg1: i32) -> (i32, i32, i32) {
    %c0_i32 = arith.constant 0 : i32
    %c0_i32_0 = arith.constant 0 : i32
    return %arg1, %c0_i32, %arg0 : i32, i32, i32
  }
}

</mosaic_0001>

<bundles_post_ra>
// kernel: tpu_custom_call.1
= control target key start
LH: loop header
LB: loop body
LE: loop exit
PB: predicated region body
PF: predicated region fallthrough
CT: control target
= control target key end

     0   :  { %7 = vsyncpa [#allocation3], 0  ;;  %s4783_s0 = inlined_call_operand.vmem [shape: f32[16,8,2], index: 0, kind: input, shape index: {}]   ;;  %s4784_s1 = inlined_call_operand.hbm [shape: f32[4,16,8,16], index: 1, kind: input, shape index: {}]   ;;  %s4785_s2 = inlined_call_operand.vmem [shape: f32[4,16,2], index: 2, kind: output, shape index: {}]  }
   0x1   :  { %9 = vsyncpa [#allocation3 + $0x1], 0  ;;  %s3732_s9 = smov 0   ;;  %s3734_s10 = smov 0  }
   0x2   :  { %s3736_s11 = smov 0   ;;  %s3738_s12 = smov 0  }
   0x3   :  { %s3740_s13 = smov 0   ;;  %s3742_s14 = smov 0  }
   0x4 LB: > { %s3318_s15 = sadd.s32 4294967295, %s3712_s14   ;;  %s24_s16 = sadd.s32 1, %s3708_s13  ;;  %s3712_s14 = sphi %s3742_s14, %s15_s14   ;;  %s3708_s13 = sphi %s3740_s13, %s4962_s13   ;;  %s3704_s12 = sphi %s3738_s12, %s4961_s12   ;;  %s3700_s11 = sphi %s3736_s11, %s4960_s11   ;;  %s3696_s10 = sphi %s3734_s10, %s4959_s10   ;;  %s3692_s9 = sphi %s3732_s9, %s4958_s9  }
   0x5   : > { %p25_p0 = scmp.ge.s32.totalorder %s24_s16, 4  ;;  %s60_s17 = sadd.s32 1, %s3700_s11 }
   0x6   : > { %p67_p1 = scmp.ne.s32.totalorder %s3700_s11, %s3696_s10  ;;  %p68_p2 = scmp.eq.s32.totalorder %s3712_s14, 0 }
   0x7   : > { %s4964_s16 = smov (%p25_p0, %s24_s16), 0  ;;  %p73_p4 = scmp.ne.s32.totalorder %s3696_s10, %s3692_s9 }
   0x8   : > { %p3768_p3 = por %p68_p2, %p67_p1  ;;  %s57_s19 = ssub.s32 %s3708_s13, %s4964_s16 }
   0x9   : > { %p74_p5 = scmp.eq.s32.totalorder %s3318_s15, 0  ;;  %p58_p6 = scmp.eq.s32.totalorder %s57_s19, 0 }
   0xa   : > { %p3500_p8 = scmp.lt.s32.totalorder %s3712_s14, 4  ;;  %s132_s22 = sand.u32 1, %s3700_s11  }
   0xb   : > { %p3775_p7 = por %p74_p5, %p73_p4  ;;  %s3364_s23 = sshll.u32 %s3708_s13, 11 }
   0xc   : > { %s3781_s21 = scalar_select %p58_p6, %s3700_s11, %s60_s17  }
   0xd   : > { %s3323_s24 = sshll.u32 %s132_s22, 7  ;;  %s3788_s27 = scalar_lea.hbm %s4784_s1, %s3364_s23 }
   0xe   : > { %s136_s28 = scalar_lea.vmem [#allocation2], %s3323_s24  ;;  %p3792_p9 = pnand %p3500_p8, %p3768_p3 }
   0xf   : > { %s143_s29 = sshll.u32 %s136_s28, 4  ;;  %s3798_s3 = scalar_lea.sflag [#allocation3], %s132_s22  ;;  %s3796_s29 = int_to_ptr.vmem [resolvable:$true] %s143_s29 }
  0x10   : > { %s3632_s4 = scalar_lea.hbm %s3788_s27, 2048  ;;  %p3634_p11 = pneg %p3792_p9 }
  0x11   : > { %p3633_p10 = scmp.ne.s32.totalorder %s3788_s27, %s3632_s4  ;;  %s3637_s7 = scalar_lea.hbm %s4784_s1, 8192 }
  0x12   : > { %p3638_p0 = scmp.lt.u32.totalorder %s3788_s27, %s4784_s1  ;;  %p3639_p1 = scmp.lt.u32.totalorder %s3637_s7, %s3632_s4 }
  0x13   : > { %p3635_p12 = pnand %p3634_p11, %p3633_p10  ;;  %p3641_p3 = scmp.lt.u32.totalorder %s3632_s4, %s3788_s27 }
  0x14   : > { %p3640_p2 = por %p3639_p1, %p3638_p0 }
  0x15   : > { %p3636_p13 = pneg %p3635_p12 }
  0x16   : > { %p3642_p4 = por %p3641_p3, %p3640_p2 }
  0x18   : > { %p3643_p5 = pnand %p3642_p4, %p3636_p13 }
  0x1a   : > { %3646 = shalt.err (!%p3643_p5)
}
  0x1b   : > { %s3647_s15 = scalar_lea.vmem %s3796_s29, 2048  ;;  %s3714_s17 = smov [#allocation2]  }
  0x1c   : > { %p3648_p6 = scmp.ne.s32.totalorder %s3796_s29, %s3647_s15  ;;  %s3652_s18 = sshll.u32 %s3714_s17, 4  ;;  %s3653_s18 = int_to_ptr.vmem [resolvable:$false] %s3652_s18 }
  0x1d   : > { %s3654_s19 = scalar_lea.vmem %s3653_s18, 4096  ;;  %p3655_p12 = scmp.lt.s32.totalorder %s3796_s29, %s3653_s18 }
  0x1e   : > { %p3650_p8 = pnand %p3648_p6, %p3634_p11  ;;  %p3656_p0 = scmp.lt.s32.totalorder %s3654_s19, %s3647_s15 }
  0x20   : > { %p3651_p10 = pneg %p3650_p8  ;;  %p3657_p1 = por %p3656_p0, %p3655_p12 }
  0x22   : > { %p3658_p2 = pnand %p3657_p1, %p3651_p10 }
  0x24   : > { %3661 = shalt.err (!%p3658_p2)
}
  0x25   : > { %s3715_s22 = smov 128   ;;  %s3716_s23 = smov 8  }
  0x26   : > { %3499 = dma.hbm_to_vmem [thread:$0]  (!%p3792_p9), %s3788_s27, 2048, %s3796_s29, %s3798_s3, %s3715_s22, %s3715_s22, %s3716_s23  }
  0x27   : > { %p3326_p11 = scmp.ge.s32.totalorder %s3712_s14, 1  ;;  %p151_p13 = scmp.lt.s32.totalorder %s3712_s14, 5 }
  0x29   : > { %p152_p3 = pnand %p3326_p11, %p151_p13 }
  0x2b   : > { %155 = sbr.rel (%p152_p3) target bundleno = 904 (0x388), region = 28 }
  0x32   : > { %s157_s24 = sand.u32 1, %s3696_s10  }
  0x33   : > { %s3327_s25 = sshll.u32 %s157_s24, 7  ;;  %s158_s26 = scalar_lea.sflag [#allocation3], %s157_s24 }
  0x34   : > { %s3829_s28 = scalar_lea.vmem [#allocation2], %s3327_s25 }
  0x35   : > { %3687 = dma.done.wait (%p3775_p7), %s158_s26, 2048  }
  0x36   : > { %3689 = vsyncadd (%p3775_p7), %s158_s26, 4294965248  ;;  %v217_v0 = vld [vmem:[%s3829_s28] sm:$0xff]  ;;  %v219_v1 = vld [vmem:[%s3829_s28 + $0x10] sm:$0xff]  ;;  %vm265_vm0 = vcmask 64512   ;;  %vm2075_vm1 = vcmask 15360   ;;  %vm2445_vm2 = vcmask 1041409  }
  0x37   : > { %233 = vxpose.xlu0.b32.start.end [1/1] (short) (narrow) %v217_v0, 16  ;;  %460 = vxpose.xlu1.b32.start.end [1/1] (short) (narrow) %v219_v1, 16  ;;  %v218_v2 = vld [vmem:[%s3829_s28 + $0x8] sm:$0xff]  ;;  %v220_v3 = vld [vmem:[%s3829_s28 + $0x18] sm:$0xff]  ;;  %v201_v4 = vld [vmem:[%s4783_s0] sm:$0xff]  ;;  %vm2448_vm3 = vcmask 1042434  }
  0x38   : > { %3414 = vmatprep.subr.mxu0 %v201_v4  ;;  %v203_v5 = vld [vmem:[%s4783_s0 + $0x10] sm:$0xff]  ;;  %v221_v6 = vld [vmem:[%s3829_s28 + $0x20] sm:$0xff]  ;;  %v222_v7 = vld [vmem:[%s3829_s28 + $0x28] sm:$0xff]  ;;  %vm2451_vm4 = vcmask 1043459   ;;  %vm2454_vm5 = vcmask 1044484   ;;  %vm2457_vm6 = vcmask 1045509  }
  0x39   : > { %3415 = vmatpush3.msra.mxu0 %v201_v4  ;;  %v202_v8 = vld [vmem:[%s4783_s0 + $0x8] sm:$0xff]  ;;  %v223_v9 = vld [vmem:[%s3829_s28 + $0x30] sm:$0xff]  ;;  %v224_v10 = vld [vmem:[%s3829_s28 + $0x38] sm:$0xff]  ;;  %vm2460_vm7 = vcmask 1046534   ;;  %vm2463_vm8 = vcmask 1047559   ;;  %p193_p7 = scmp.lt.s32.totalorder %s3704_s12, 3 }
  0x3a   : > { %3424 = vmatprep.subr.mxu0 %v203_v5  ;;  %3419 = vmatprep.subr.mxu1 %v202_v8  ;;  %v204_v11 = vld [vmem:[%s4783_s0 + $0x18] sm:$0xff]  ;;  %v225_v12 = vld [vmem:[%s3829_s28 + $0x40] sm:$0xff]  ;;  %v226_v13 = vld [vmem:[%s3829_s28 + $0x48] sm:$0xff] }
  0x3b   : > { %3420 = vmatpush3.msra.mxu1 %v202_v8  ;;  %v227_v14 = vld [vmem:[%s3829_s28 + $0x50] sm:$0xff]  ;;  %v228_v15 = vld [vmem:[%s3829_s28 + $0x58] sm:$0xff]  ;;  %v229_v16 = vld [vmem:[%s3829_s28 + $0x60] sm:$0xff]  ;;  %s4966_s12 = smov (!%p193_p7, %s3704_s12), 3 }
  0x3c   : > { %347 = vxpose.xlu0.b32.start.end [1/1] (short) (narrow) %v218_v2, 16  ;;  %573 = vxpose.xlu1.b32.start.end [1/1] (short) (narrow) %v220_v3, 16  ;;  %v230_v17 = vld [vmem:[%s3829_s28 + $0x68] sm:$0xff]  ;;  %v231_v18 = vld [vmem:[%s3829_s28 + $0x70] sm:$0xff]  ;;  %v232_v19 = vld [vmem:[%s3829_s28 + $0x78] sm:$0xff]  ;;  %s3365_s15 = sshll.u32 %s4966_s12, 4 }
  0x3d   : > { %3429 = vmatprep.subr.mxu1 %v204_v11  ;;  %v205_v24 = vld [vmem:[%s4783_s0 + $0x20] sm:$0xff]  ;;  %v207_v27 = vld [vmem:[%s4783_s0 + $0x30] sm:$0xff]  ;;  %v206_v30 = vld [vmem:[%s4783_s0 + $0x28] sm:$0xff]  ;;  %s200_s19 = scalar_lea.vmem %s4785_s2, %s3365_s15 }
  0x3e   : > { %v208_v33 = vld [vmem:[%s4783_s0 + $0x38] sm:$0xff]  ;;  %v209_v36 = vld [vmem:[%s4783_s0 + $0x40] sm:$0xff]  ;;  %v210_v37 = vld [vmem:[%s4783_s0 + $0x48] sm:$0xff] }
  0x3f   : > { %v211_v42 = vld [vmem:[%s4783_s0 + $0x50] sm:$0xff]  ;;  %v212_v43 = vld [vmem:[%s4783_s0 + $0x58] sm:$0xff]  ;;  %v213_v48 = vld [vmem:[%s4783_s0 + $0x60] sm:$0xff] }
  0x40   : > { %v214_v49 = vld [vmem:[%s4783_s0 + $0x68] sm:$0xff]  ;;  %v215_v54 = vld [vmem:[%s4783_s0 + $0x70] sm:$0xff]  ;;  %v216_v55 = vld [vmem:[%s4783_s0 + $0x78] sm:$0xff] }
  0x41   : > { %686 = vxpose.xlu0.b32.start.end [1/1] (short) (narrow) %v221_v6, 16  ;;  %799 = vxpose.xlu1.b32.start.end [1/1] (short) (narrow) %v222_v7, 16 }
  0x46   : > { %912 = vxpose.xlu0.b32.start.end [1/1] (short) (narrow) %v223_v9, 16  ;;  %1025 = vxpose.xlu1.b32.start.end [1/1] (short) (narrow) %v224_v10, 16 }
  0x4b   : > { %1138 = vxpose.xlu0.b32.start.end [1/1] (short) (narrow) %v225_v12, 16  ;;  %1251 = vxpose.xlu1.b32.start.end [1/1] (short) (narrow) %v226_v13, 16 }
  0x50   : > { %1364 = vxpose.xlu0.b32.start.end [1/1] (short) (narrow) %v227_v14, 16  ;;  %1477 = vxpose.xlu1.b32.start.end [1/1] (short) (narrow) %v228_v15, 16 }
  0x55   : > { %1590 = vxpose.xlu0.b32.start.end [1/1] (short) (narrow) %v229_v16, 16  ;;  %1703 = vxpose.xlu1.b32.start.end [1/1] (short) (narrow) %v230_v17, 16 }
  0x5a   : > { %1816 = vxpose.xlu0.b32.start.end [1/1] (short) (narrow) %v231_v18, 16  ;;  %1929 = vxpose.xlu1.b32.start.end [1/1] (short) (narrow) %v232_v19, 16 }
  0xb7   : > { %v249_v20 = vpop.trf.xlu0  ;;  %v476_v21 = vpop.trf.xlu1 }
  0xb8   : > { %3416 = vmatprep.mubr.msk.f32.mxu0 %vm265_vm0, %v249_v20 }
  0xbb   : > { %v250_v22 = vpop.trf.xlu0  ;;  %v477_v23 = vpop.trf.xlu1 }
  0xbc   : > { %3417 = vmatmul.mubr.msk.f32.vlgmr.msra.gmra.mrb[0].mxu0 %vm265_vm0, %v250_v22 }
  0xbd   : > { %3426 = vmatprep.mubr.msk.f32.mxu0 %vm265_vm0, %v476_v21  ;;  %3425 = vmatpush3.msra.mxu0 %v203_v5 }
  0xbe   : > { %3434 = vmatprep.subr.mxu0 %v205_v24 }
  0xbf   : > { %v363_v25 = vpop.trf.xlu0  ;;  %v589_v26 = vpop.trf.xlu1 }
  0xc0   : > { %3421 = vmatprep.mubr.msk.f32.mxu1 %vm265_vm0, %v363_v25  ;;  %3427 = vmatmul.mubr.msk.f32.vlgmr.msra.gmra.mrb[2].mxu0 %vm265_vm0, %v477_v23 }
  0xc1   : > { %3435 = vmatpush3.msra.mxu0 %v205_v24 }
  0xc2   : > { %3444 = vmatprep.subr.mxu0 %v207_v27 }
  0xc3   : > { %v364_v28 = vpop.trf.xlu0  ;;  %v590_v29 = vpop.trf.xlu1 }
  0xc4   : > { %3422 = vmatmul.mubr.msk.f32.vlgmr.msra.gmra.mrb[0].mxu1 %vm265_vm0, %v364_v28 }
  0xc5   : > { %3431 = vmatprep.mubr.msk.f32.mxu1 %vm265_vm0, %v589_v26  ;;  %3430 = vmatpush3.msra.mxu1 %v204_v11 }
  0xc6   : > { %3439 = vmatprep.subr.mxu1 %v206_v30 }
  0xc7   : > { %v702_v31 = vpop.trf.xlu0  ;;  %v815_v32 = vpop.trf.xlu1 }
  0xc8   : > { %3432 = vmatmul.mubr.msk.f32.vlgmr.msra.gmra.mrb[2].mxu1 %vm265_vm0, %v590_v29  ;;  %3436 = vmatprep.mubr.msk.f32.mxu0 %vm265_vm0, %v702_v31 }
  0xc9   : > { %3441 = vmatprep.mubr.msk.f32.mxu1 %vm265_vm0, %v815_v32  ;;  %3440 = vmatpush3.msra.mxu1 %v206_v30 }
  0xca   : > { %3449 = vmatprep.subr.mxu1 %v208_v33 }
  0xcb   : > { %v703_v34 = vpop.trf.xlu0  ;;  %v816_v35 = vpop.trf.xlu1 }
  0xcc   : > { %3437 = vmatmul.mubr.msk.f32.vlgmr.msra.gmra.mrb[4].mxu0 %vm265_vm0, %v703_v34  ;;  %3442 = vmatmul.mubr.msk.f32.vlgmr.msra.gmra.mrb[4].mxu1 %vm265_vm0, %v816_v35 }
  0xcd   : > { %3445 = vmatpush3.msra.mxu0 %v207_v27  ;;  %3450 = vmatpush3.msra.mxu1 %v208_v33 }
  0xce   : > { %3454 = vmatprep.subr.mxu0 %v209_v36  ;;  %3459 = vmatprep.subr.mxu1 %v210_v37 }
  0xcf   : > { %v928_v38 = vpop.trf.xlu0  ;;  %v1041_v39 = vpop.trf.xlu1 }
  0xd0   : > { %3446 = vmatprep.mubr.msk.f32.mxu0 %vm265_vm0, %v928_v38  ;;  %3451 = vmatprep.mubr.msk.f32.mxu1 %vm265_vm0, %v1041_v39 }
  0xd3   : > { %v929_v40 = vpop.trf.xlu0  ;;  %v1042_v41 = vpop.trf.xlu1 }
  0xd4   : > { %3447 = vmatmul.mubr.msk.f32.vlgmr.msra.gmra.mrb[6].mxu0 %vm265_vm0, %v929_v40  ;;  %3452 = vmatmul.mubr.msk.f32.vlgmr.msra.gmra.mrb[6].mxu1 %vm265_vm0, %v1042_v41 }
  0xd5   : > { %3455 = vmatpush3.msra.mxu0 %v209_v36  ;;  %3460 = vmatpush3.msra.mxu1 %v210_v37 }
  0xd6   : > { %3464 = vmatprep.subr.mxu0 %v211_v42  ;;  %3469 = vmatprep.subr.mxu1 %v212_v43 }
  0xd7   : > { %v1154_v44 = vpop.trf.xlu0  ;;  %v1267_v45 = vpop.trf.xlu1 }
  0xd8   : > { %3456 = vmatprep.mubr.msk.f32.mxu0 %vm265_vm0, %v1154_v44  ;;  %3461 = vmatprep.mubr.msk.f32.mxu1 %vm265_vm0, %v1267_v45 }
  0xdb   : > { %v1155_v46 = vpop.trf.xlu0  ;;  %v1268_v47 = vpop.trf.xlu1 }
  0xdc   : > { %3457 = vmatmul.mubr.msk.f32.vlgmr.msra.gmra.mrb[8].mxu0 %vm265_vm0, %v1155_v46  ;;  %3462 = vmatmul.mubr.msk.f32.vlgmr.msra.gmra.mrb[8].mxu1 %vm265_vm0, %v1268_v47 }
  0xdd   : > { %3465 = vmatpush3.msra.mxu0 %v211_v42  ;;  %3470 = vmatpush3.msra.mxu1 %v212_v43 }
  0xde   : > { %3474 = vmatprep.subr.mxu0 %v213_v48  ;;  %3479 = vmatprep.subr.mxu1 %v214_v49 }
  0xdf   : > { %v1380_v50 = vpop.trf.xlu0  ;;  %v1493_v51 = vpop.trf.xlu1 }
  0xe0   : > { %3466 = vmatprep.mubr.msk.f32.mxu0 %vm265_vm0, %v1380_v50  ;;  %3471 = vmatprep.mubr.msk.f32.mxu1 %vm265_vm0, %v1493_v51 }
  0xe3   : > { %v1381_v52 = vpop.trf.xlu0  ;;  %v1494_v53 = vpop.trf.xlu1 }
  0xe4   : > { %3467 = vmatmul.mubr.msk.f32.vlgmr.msra.gmra.mrb[10].mxu0 %vm265_vm0, %v1381_v52  ;;  %3472 = vmatmul.mubr.msk.f32.vlgmr.msra.gmra.mrb[10].mxu1 %vm265_vm0, %v1494_v53 }
  0xe5   : > { %3475 = vmatpush3.msra.mxu0 %v213_v48  ;;  %3480 = vmatpush3.msra.mxu1 %v214_v49 }
  0xe6   : > { %3484 = vmatprep.subr.mxu0 %v215_v54  ;;  %3489 = vmatprep.subr.mxu1 %v216_v55 }
  0xe7   : > { %v1606_v56 = vpop.trf.xlu0  ;;  %v1719_v57 = vpop.trf.xlu1 }
  0xe8   : > { %3476 = vmatprep.mubr.msk.f32.mxu0 %vm265_vm0, %v1606_v56  ;;  %3481 = vmatprep.mubr.msk.f32.mxu1 %vm265_vm0, %v1719_v57 }
  0xeb   : > { %v1607_v58 = vpop.trf.xlu0  ;;  %v1720_v59 = vpop.trf.xlu1 }
  0xec   : > { %3477 = vmatmul.mubr.msk.f32.vlgmr.msra.gmra.mrb[12].mxu0 %vm265_vm0, %v1607_v58  ;;  %3482 = vmatmul.mubr.msk.f32.vlgmr.msra.gmra.mrb[12].mxu1 %vm265_vm0, %v1720_v59 }
  0xed   : > { %3485 = vmatpush3.msra.mxu0 %v215_v54  ;;  %3490 = vmatpush3.msra.mxu1 %v216_v55 }
  0xef   : > { %v1832_v60 = vpop.trf.xlu0  ;;  %v1945_v61 = vpop.trf.xlu1 }
  0xf0   : > { %3486 = vmatprep.mubr.msk.f32.mxu0 %vm265_vm0, %v1832_v60  ;;  %3491 = vmatprep.mubr.msk.f32.mxu1 %vm265_vm0, %v1945_v61 }
  0xf3   : > { %v1833_v62 = vpop.trf.xlu0  ;;  %v1946_v63 = vpop.trf.xlu1 }
  0xf4   : > { %3487 = vmatmul.mubr.msk.f32.vlgmr.msra.gmra.mrb[14].mxu0 %vm265_vm0, %v1833_v62  ;;  %3492 = vmatmul.mubr.msk.f32.vlgmr.msra.gmra.mrb[14].mxu1 %vm265_vm0, %v1946_v63 }
 0x18f   : > { %v3931_v0 = vpop.f32.mrb[0].mxu0 }
 0x190   : > { %v3933_v1 = vpop.f32.mrb[1].mxu0  ;;  %v2044_v4 = vmul.f32 0.0625, %v3931_v0 }
 0x191   : > { %v2043_v5 = vmul.f32 0.0625, %v3933_v1 }
 0x192   : > { %v2107_v12 = vsel %vm2075_vm1, %v2044_v4, 0.0 }
 0x193   : > { %v3935_v2 = vpop.f32.mrb[2].mxu0  ;;  %v2076_v14 = vsel %vm2075_vm1, %v2043_v5, 0.0 }
 0x194   : > { %4859 = vst [vmem:[#allocation5_spill] sm:$0xff] %v3935_v2  ;;  %v3937_v3 = vpop.f32.mrb[3].mxu0  ;;  %v2048_v7 = vmul.f32 0.0625, %v3935_v2 }
 0x195   : > { %v2047_v10 = vmul.f32 0.0625, %v3937_v3 }
 0x196   : > { %v2110_v18 = vsel %vm2075_vm1, %v2048_v7, 0.0 }
 0x197   : > { %v3941_v6 = vpop.f32.mrb[0].mxu1  ;;  %v2079_v22 = vsel %vm2075_vm1, %v2047_v10, 0.0 }
 0x198   : > { %4860 = vst [vmem:[#allocation6_spill] sm:$0xff] %v3941_v6  ;;  %v2046_v8 = vmul.f32 0.0625, %v3941_v6  ;;  %v3945_v9 = vpop.f32.mrb[1].mxu1 }
 0x199   : > { %v2045_v11 = vmul.f32 0.0625, %v3945_v9 }
 0x19a   : > { %v2108_v13 = vsel %vm2075_vm1, %v2046_v8, 0.0 }
 0x19b   : > { %v2109_v15 = vadd.f32 %v2108_v13, %v2107_v12  ;;  %v2077_v16 = vsel %vm2075_vm1, %v2045_v11, 0.0  ;;  %v3953_v17 = vpop.f32.mrb[2].mxu1 }
 0x19c   : > { %4861 = vst [vmem:[#allocation7_spill] sm:$0xff] %v3953_v17  ;;  %v2078_v19 = vadd.f32 %v2077_v16, %v2076_v14  ;;  %v2050_v20 = vmul.f32 0.0625, %v3953_v17  ;;  %v3957_v21 = vpop.f32.mrb[3].mxu1 }
 0x19d   : > { %4862 = vst [vmem:[#allocation8_spill] sm:$0xff] %v3957_v21  ;;  %v2111_v23 = vadd.f32 %v2110_v18, %v2109_v15  ;;  %v2049_v24 = vmul.f32 0.0625, %v3957_v21 }
 0x19e   : > { %v2112_v25 = vsel %vm2075_vm1, %v2050_v20, 0.0  ;;  %v2080_v26 = vadd.f32 %v2079_v22, %v2078_v19 }
 0x19f   : > { %v2113_v27 = vadd.f32 %v2112_v25, %v2111_v23  ;;  %v2081_v28 = vsel %vm2075_vm1, %v2049_v24, 0.0  ;;  %v3963_v29 = vpop.f32.mrb[4].mxu0  ;;  %v3965_v30 = vpop.f32.mrb[4].mxu1 }
 0x1a0   : > { %4863 = vst [vmem:[#allocation9_spill] sm:$0xff] %v3963_v29  ;;  %4864 = vst [vmem:[#allocation10_spill] sm:$0xff] %v3965_v30  ;;  %v2082_v31 = vadd.f32 %v2081_v28, %v2080_v26  ;;  %v2052_v32 = vmul.f32 0.0625, %v3963_v29  ;;  %v3968_v33 = vpop.f32.mrb[5].mxu0  ;;  %v2054_v34 = vmul.f32 0.0625, %v3965_v30  ;;  %v3971_v35 = vpop.f32.mrb[5].mxu1 }
 0x1a1   : > { %4865 = vst [vmem:[#allocation11_spill] sm:$0xff] %v3968_v33  ;;  %4866 = vst [vmem:[#allocation12_spill] sm:$0xff] %v3971_v35  ;;  %v2051_v36 = vmul.f32 0.0625, %v3968_v33  ;;  %v2053_v37 = vmul.f32 0.0625, %v3971_v35 }
 0x1a2   : > { %v2114_v38 = vsel %vm2075_vm1, %v2052_v32, 0.0  ;;  %v2116_v39 = vsel %vm2075_vm1, %v2054_v34, 0.0 }
 0x1a3   : > { %v2115_v40 = vadd.f32 %v2114_v38, %v2113_v27  ;;  %v2083_v41 = vsel %vm2075_vm1, %v2051_v36, 0.0  ;;  %v2085_v42 = vsel %vm2075_vm1, %v2053_v37, 0.0 }
 0x1a4   : > { %v2084_v43 = vadd.f32 %v2083_v41, %v2082_v31 }
 0x1a5   : > { %v2117_v44 = vadd.f32 %v2116_v39, %v2115_v40 }
 0x1a6   : > { %v2086_v45 = vadd.f32 %v2085_v42, %v2084_v43 }
 0x1a7   : > { %v3979_v46 = vpop.f32.mrb[6].mxu0  ;;  %v3981_v47 = vpop.f32.mrb[6].mxu1 }
 0x1a8   : > { %4867 = vst [vmem:[#allocation13_spill] sm:$0xff] %v3979_v46  ;;  %4868 = vst [vmem:[#allocation14_spill] sm:$0xff] %v3981_v47  ;;  %v2056_v48 = vmul.f32 0.0625, %v3979_v46  ;;  %v3984_v49 = vpop.f32.mrb[7].mxu0  ;;  %v2058_v50 = vmul.f32 0.0625, %v3981_v47  ;;  %v3987_v51 = vpop.f32.mrb[7].mxu1 }
 0x1a9   : > { %4869 = vst [vmem:[#allocation15_spill] sm:$0xff] %v3984_v49  ;;  %4870 = vst [vmem:[#allocation16_spill] sm:$0xff] %v3987_v51  ;;  %v2055_v52 = vmul.f32 0.0625, %v3984_v49  ;;  %v2057_v53 = vmul.f32 0.0625, %v3987_v51 }
 0x1aa   : > { %v2118_v54 = vsel %vm2075_vm1, %v2056_v48, 0.0  ;;  %v2120_v55 = vsel %vm2075_vm1, %v2058_v50, 0.0 }
 0x1ab   : > { %v2119_v56 = vadd.f32 %v2118_v54, %v2117_v44  ;;  %v2087_v57 = vsel %vm2075_vm1, %v2055_v52, 0.0  ;;  %v2089_v58 = vsel %vm2075_vm1, %v2057_v53, 0.0 }
 0x1ac   : > { %v2088_v59 = vadd.f32 %v2087_v57, %v2086_v45 }
 0x1ad   : > { %v2121_v60 = vadd.f32 %v2120_v55, %v2119_v56 }
 0x1ae   : > { %v2090_v61 = vadd.f32 %v2089_v58, %v2088_v59 }
 0x1af   : > { %v3995_v62 = vpop.f32.mrb[8].mxu0  ;;  %v3997_v63 = vpop.f32.mrb[8].mxu1 }
 0x1b0   : > { %4871 = vst [vmem:[#allocation17_spill] sm:$0xff] %v3995_v62  ;;  %4872 = vst [vmem:[#allocation18_spill] sm:$0xff] %v3997_v63  ;;  %v2060_v4 = vmul.f32 0.0625, %v3995_v62  ;;  %v4000_v5 = vpop.f32.mrb[9].mxu0  ;;  %v2062_v7 = vmul.f32 0.0625, %v3997_v63  ;;  %v4003_v8 = vpop.f32.mrb[9].mxu1 }
 0x1b1   : > { %4873 = vst [vmem:[#allocation19_spill] sm:$0xff] %v4000_v5  ;;  %4874 = vst [vmem:[#allocation20_spill] sm:$0xff] %v4003_v8  ;;  %v2059_v10 = vmul.f32 0.0625, %v4000_v5  ;;  %v2061_v11 = vmul.f32 0.0625, %v4003_v8 }
 0x1b2   : > { %v2122_v12 = vsel %vm2075_vm1, %v2060_v4, 0.0  ;;  %v2124_v13 = vsel %vm2075_vm1, %v2062_v7, 0.0 }
 0x1b3   : > { %v2123_v14 = vadd.f32 %v2122_v12, %v2121_v60  ;;  %v2091_v15 = vsel %vm2075_vm1, %v2059_v10, 0.0  ;;  %v2093_v16 = vsel %vm2075_vm1, %v2061_v11, 0.0 }
 0x1b4   : > { %v2092_v18 = vadd.f32 %v2091_v15, %v2090_v61 }
 0x1b5   : > { %v2125_v19 = vadd.f32 %v2124_v13, %v2123_v14 }
 0x1b6   : > { %v2094_v20 = vadd.f32 %v2093_v16, %v2092_v18 }
 0x1b7   : > { %v4011_v22 = vpop.f32.mrb[10].mxu0  ;;  %v4013_v23 = vpop.f32.mrb[10].mxu1 }
 0x1b8   : > { %4875 = vst [vmem:[#allocation21_spill] sm:$0xff] %v4011_v22  ;;  %4876 = vst [vmem:[#allocation22_spill] sm:$0xff] %v4013_v23  ;;  %v2064_v24 = vmul.f32 0.0625, %v4011_v22  ;;  %v4016_v25 = vpop.f32.mrb[11].mxu0  ;;  %v2066_v26 = vmul.f32 0.0625, %v4013_v23  ;;  %v4019_v27 = vpop.f32.mrb[11].mxu1 }
 0x1b9   : > { %4877 = vst [vmem:[#allocation23_spill] sm:$0xff] %v4016_v25  ;;  %4878 = vst [vmem:[#allocation24_spill] sm:$0xff] %v4019_v27  ;;  %v2063_v28 = vmul.f32 0.0625, %v4016_v25  ;;  %v2065_v31 = vmul.f32 0.0625, %v4019_v27 }
 0x1ba   : > { %v2126_v32 = vsel %vm2075_vm1, %v2064_v24, 0.0  ;;  %v2128_v34 = vsel %vm2075_vm1, %v2066_v26, 0.0 }
 0x1bb   : > { %v2127_v36 = vadd.f32 %v2126_v32, %v2125_v19  ;;  %v2095_v37 = vsel %vm2075_vm1, %v2063_v28, 0.0  ;;  %v2097_v38 = vsel %vm2075_vm1, %v2065_v31, 0.0 }
 0x1bc   : > { %v2096_v39 = vadd.f32 %v2095_v37, %v2094_v20 }
 0x1bd   : > { %v2129_v40 = vadd.f32 %v2128_v34, %v2127_v36 }
 0x1be   : > { %v2098_v41 = vadd.f32 %v2097_v38, %v2096_v39 }
 0x1bf   : > { %v4027_v42 = vpop.f32.mrb[12].mxu0  ;;  %v4029_v43 = vpop.f32.mrb[12].mxu1 }
 0x1c0   : > { %4879 = vst [vmem:[#allocation25_spill] sm:$0xff] %v4027_v42  ;;  %4880 = vst [vmem:[#allocation26_spill] sm:$0xff] %v4029_v43  ;;  %v2068_v44 = vmul.f32 0.0625, %v4027_v42  ;;  %v4032_v45 = vpop.f32.mrb[13].mxu0  ;;  %v2070_v48 = vmul.f32 0.0625, %v4029_v43  ;;  %v4035_v50 = vpop.f32.mrb[13].mxu1 }
 0x1c1   : > { %4881 = vst [vmem:[#allocation27_spill] sm:$0xff] %v4032_v45  ;;  %4882 = vst [vmem:[#allocation28_spill] sm:$0xff] %v4035_v50  ;;  %v2067_v52 = vmul.f32 0.0625, %v4032_v45  ;;  %v2069_v53 = vmul.f32 0.0625, %v4035_v50 }
 0x1c2   : > { %v2130_v54 = vsel %vm2075_vm1, %v2068_v44, 0.0  ;;  %v2132_v55 = vsel %vm2075_vm1, %v2070_v48, 0.0 }
 0x1c3   : > { %v2131_v56 = vadd.f32 %v2130_v54, %v2129_v40  ;;  %v2099_v57 = vsel %vm2075_vm1, %v2067_v52, 0.0  ;;  %v2101_v58 = vsel %vm2075_vm1, %v2069_v53, 0.0 }
 0x1c4   : > { %v2100_v59 = vadd.f32 %v2099_v57, %v2098_v41 }
 0x1c5   : > { %v2133_v60 = vadd.f32 %v2132_v55, %v2131_v56 }
 0x1c6   : > { %v2102_v61 = vadd.f32 %v2101_v58, %v2100_v59 }
 0x1c7   : > { %v4043_v4 = vpop.f32.mrb[14].mxu0  ;;  %v4045_v7 = vpop.f32.mrb[14].mxu1 }
 0x1c8   : > { %4883 = vst [vmem:[#allocation29_spill] sm:$0xff] %v4043_v4  ;;  %4884 = vst [vmem:[#allocation30_spill] sm:$0xff] %v4045_v7  ;;  %v2072_v10 = vmul.f32 0.0625, %v4043_v4  ;;  %v4048_v11 = vpop.f32.mrb[15].mxu0  ;;  %v2074_v12 = vmul.f32 0.0625, %v4045_v7  ;;  %v4051_v13 = vpop.f32.mrb[15].mxu1 }
 0x1c9   : > { %4885 = vst [vmem:[#allocation31_spill] sm:$0xff] %v4048_v11  ;;  %4886 = vst [vmem:[#allocation32_spill] sm:$0xff] %v4051_v13  ;;  %v2071_v14 = vmul.f32 0.0625, %v4048_v11  ;;  %v2073_v15 = vmul.f32 0.0625, %v4051_v13 }
 0x1ca   : > { %v2134_v16 = vsel %vm2075_vm1, %v2072_v10, 0.0  ;;  %v2136_v18 = vsel %vm2075_vm1, %v2074_v12, 0.0 }
 0x1cb   : > { %v2135_v19 = vadd.f32 %v2134_v16, %v2133_v60  ;;  %v2103_v20 = vsel %vm2075_vm1, %v2071_v14, 0.0  ;;  %v2105_v24 = vsel %vm2075_vm1, %v2073_v15, 0.0 }
 0x1cc   : > { %v2104_v26 = vadd.f32 %v2103_v20, %v2102_v61 }
 0x1cd   : > { %v2137_v28 = vadd.f32 %v2136_v18, %v2135_v19 }
 0x1ce   : > { %v2106_v31 = vadd.f32 %v2105_v24, %v2104_v26 }
 0x1cf   : > { %v2139_v32 = vmul.f32 %v2137_v28, %v2137_v28 }
 0x1d0   : > { %v2138_v34 = vmul.f32 %v2106_v31, %v2106_v31 }
 0x1d1   : > { %v2141_v36 = vsel %vm2075_vm1, %v2139_v32, 0.0 }
 0x1d2   : > { %v2140_v37 = vsel %vm2075_vm1, %v2138_v34, 0.0 }
 0x1d3   : > { %v2142_v38 = vadd.f32 %v2141_v36, %v2140_v37 }
 0x1d5   : > { %v2143_v39 = vrot.slane %v2142_v38, 4 }
 0x1d7   : > { %v2144_v40 = vadd.f32 %v2143_v39, %v2142_v38 }
 0x1d9   : > { %v2145_v41 = vrot.slane %v2144_v40, 2 }
 0x1db   : > { %v2146_v44 = vadd.f32 %v2145_v41, %v2144_v40 }
 0x1dd   : > { %v2147_v48 = vrot.slane %v2146_v44, 1 }
 0x1df   : > { %v2148_v52 = vadd.f32 %v2147_v48, %v2146_v44 }
 0x1e1   : > { %3552 = vrsqrt.f32 %v2148_v52  ;;  %v2153_v53 = vadd.f32 1.0, %v2148_v52 }
 0x1e3   : > { %3554 = vrcp.f32 %v2153_v53 }
 0x1eb   : > { %v3553_v54 = vpop.eup %3552 }
 0x1ec   : > { %v2150_v55 = vmul.f32 %v3553_v54, %v2148_v52 }
 0x1ed   : > { %v3555_v58 = vpop.eup %3554 }
 0x1ee   : > { %v2151_v56 = vmul.f32 %v2150_v55, %v2106_v31  ;;  %v2152_v57 = vmul.f32 %v2150_v55, %v2137_v28 }
 0x1f0   : > { %v2155_v59 = vmul.f32 %v3555_v58, %v2151_v56  ;;  %v2156_v60 = vmul.f32 %v3555_v58, %v2152_v57 }
 0x1f2   : > { %v2157_v61 = vmul.f32 %v2155_v59, %v3933_v1  ;;  %v2158_v10 = vmul.f32 %v3931_v0, %v2156_v60  ;;  %v2159_v12 = vmul.f32 %v2155_v59, %v3945_v9  ;;  %v2160_v14 = vmul.f32 %v3941_v6, %v2156_v60 }
 0x1f3   : > { %v2161_v15 = vmul.f32 %v2155_v59, %v3937_v3  ;;  %v2162_v16 = vmul.f32 %v3935_v2, %v2156_v60  ;;  %v2163_v18 = vmul.f32 %v2155_v59, %v3957_v21  ;;  %v2164_v19 = vmul.f32 %v3953_v17, %v2156_v60 }
 0x1f4   : > { %v2165_v20 = vmul.f32 %v2155_v59, %v3968_v33  ;;  %v2166_v24 = vmul.f32 %v3963_v29, %v2156_v60  ;;  %v2167_v26 = vmul.f32 %v2155_v59, %v3971_v35  ;;  %v2168_v28 = vmul.f32 %v3965_v30, %v2156_v60 }
 0x1f5   : > { %v2169_v31 = vmul.f32 %v2155_v59, %v3984_v49  ;;  %v2170_v32 = vmul.f32 %v3979_v46, %v2156_v60  ;;  %v2171_v34 = vmul.f32 %v2155_v59, %v3987_v51  ;;  %v2172_v36 = vmul.f32 %v3981_v47, %v2156_v60 }
 0x1f6   : > { %v4078_v37 = vmul.f32 %v2155_v59, %v4000_v5  ;;  %v4081_v38 = vmul.f32 %v3995_v62, %v2156_v60  ;;  %v4084_v39 = vmul.f32 %v2155_v59, %v4003_v8  ;;  %v4087_v40 = vmul.f32 %v3997_v63, %v2156_v60 }
 0x1f7   : > { %v4090_v41 = vmul.f32 %v2155_v59, %v4016_v25  ;;  %v4093_v44 = vmul.f32 %v4011_v22, %v2156_v60  ;;  %v4096_v48 = vmul.f32 %v2155_v59, %v4019_v27  ;;  %v4099_v52 = vmul.f32 %v4013_v23, %v2156_v60 }
 0x1f8   : > { %v4102_v53 = vmul.f32 %v2155_v59, %v4032_v45  ;;  %v4105_v54 = vmul.f32 %v4027_v42, %v2156_v60  ;;  %v4108_v55 = vmul.f32 %v2155_v59, %v4035_v50  ;;  %v4111_v56 = vmul.f32 %v4029_v43, %v2156_v60 }
 0x1f9   : > { %v4114_v57 = vmul.f32 %v2155_v59, %v4048_v11  ;;  %v4117_v58 = vmul.f32 %v4043_v4, %v2156_v60  ;;  %v4120_v63 = vmul.f32 %v2155_v59, %v4051_v13  ;;  %v4123_v62 = vmul.f32 %v4045_v7, %v2156_v60 }
 0x1fa   : > { %v2189_v8 = vsel %vm2075_vm1, %v2157_v61, 0.0  ;;  %v2190_v47 = vsel %vm2075_vm1, %v2158_v10, 0.0  ;;  %v2198_v5 = vsel %vm2075_vm1, %v2159_v12, 0.0  ;;  %v2199_v46 = vsel %vm2075_vm1, %v2160_v14, 0.0 }
 0x1fb   : > { %v2191_v51 = vadd.f32 %v2190_v47, %v2189_v8  ;;  %v2200_v30 = vadd.f32 %v2199_v46, %v2198_v5  ;;  %v2207_v49 = vsel %vm2075_vm1, %v2161_v15, 0.0  ;;  %v2208_v29 = vsel %vm2075_vm1, %v2162_v16, 0.0 }
 0x1fc   : > { %v2209_v35 = vadd.f32 %v2208_v29, %v2207_v49  ;;  %v2216_v59 = vsel %vm2075_vm1, %v2163_v18, 0.0  ;;  %v2217_v60 = vsel %vm2075_vm1, %v2164_v19, 0.0  ;;  %v2225_v17 = vsel %vm2075_vm1, %v2165_v20, 0.0 }
 0x1fd   : > { %v2192_v61 = vrot.slane %v2191_v51, 4  ;;  %v2201_v33 = vrot.slane %v2200_v30, 4  ;;  %v2218_v10 = vadd.f32 %v2217_v60, %v2216_v59  ;;  %v2226_v12 = vsel %vm2075_vm1, %v2166_v24, 0.0 }
 0x1fe   : > { %v2210_v2 = vrot.slane %v2209_v35, 4  ;;  %v2227_v14 = vadd.f32 %v2226_v12, %v2225_v17  ;;  %v2234_v46 = vsel %vm2075_vm1, %v2167_v26, 0.0  ;;  %v2235_v47 = vsel %vm2075_vm1, %v2168_v28, 0.0 }
 0x1ff   : > { %v2193_v5 = vadd.f32 %v2192_v61, %v2191_v51  ;;  %v2202_v8 = vadd.f32 %v2201_v33, %v2200_v30  ;;  %v2219_v29 = vrot.slane %v2218_v10, 4  ;;  %v2236_v49 = vadd.f32 %v2235_v47, %v2234_v46 }
 0x200   : > { %v2211_v15 = vadd.f32 %v2210_v2, %v2209_v35  ;;  %v2228_v16 = vrot.slane %v2227_v14, 4  ;;  %v2243_v18 = vsel %vm2075_vm1, %v2169_v31, 0.0  ;;  %v2244_v19 = vsel %vm2075_vm1, %v2170_v32, 0.0 }
 0x201   : > { %v2194_v20 = vrot.slane %v2193_v5, 2  ;;  %v2203_v59 = vrot.slane %v2202_v8, 2  ;;  %v2220_v60 = vadd.f32 %v2219_v29, %v2218_v10  ;;  %v2237_v24 = vrot.slane %v2236_v49, 4 }
 0x202   : > { %v2212_v21 = vrot.slane %v2211_v15, 2  ;;  %v2229_v17 = vadd.f32 %v2228_v16, %v2227_v14  ;;  %v2245_v12 = vadd.f32 %v2244_v19, %v2243_v18  ;;  %v2252_v26 = vsel %vm2075_vm1, %v2171_v34, 0.0 }
 0x203   : > { %v2195_v28 = vadd.f32 %v2194_v20, %v2193_v5  ;;  %v2204_v51 = vadd.f32 %v2203_v59, %v2202_v8  ;;  %v2221_v30 = vrot.slane %v2220_v60, 2  ;;  %v2238_v33 = vadd.f32 %v2237_v24, %v2236_v49 }
 0x204   : > { %v2213_v61 = vadd.f32 %v2212_v21, %v2211_v15  ;;  %v2230_v2 = vrot.slane %v2229_v17, 2  ;;  %v2246_v35 = vrot.slane %v2245_v12, 4  ;;  %v2253_v31 = vsel %vm2075_vm1, %v2172_v36, 0.0 }
 0x205   : > { %v2196_v46 = vrot.slane %v2195_v28, 1  ;;  %v2205_v32 = vrot.slane %v2204_v51, 1  ;;  %v2222_v47 = vadd.f32 %v2221_v30, %v2220_v60  ;;  %v2239_v6 = vrot.slane %v2238_v33, 2 }
 0x206   : > { %v2214_v10 = vrot.slane %v2213_v61, 1  ;;  %v2231_v29 = vadd.f32 %v2230_v2, %v2229_v17  ;;  %v2247_v7 = vadd.f32 %v2246_v35, %v2245_v12  ;;  %v2254_v14 = vadd.f32 %v2253_v31, %v2252_v26 }
 0x207   : > { %v4141_v16 = vadd.f32 %v2196_v46, %v2195_v28  ;;  %v4143_v34 = vadd.f32 %v2205_v32, %v2204_v51  ;;  %v2223_v5 = vrot.slane %v2222_v47, 1  ;;  %v2240_v8 = vadd.f32 %v2239_v6, %v2238_v33 }
 0x208   : > { %v4145_v49 = vadd.f32 %v2214_v10, %v2213_v61  ;;  %v2232_v21 = vrot.slane %v2231_v29, 1  ;;  %v2248_v15 = vrot.slane %v2247_v7, 2  ;;  %v2255_v18 = vrot.slane %v2254_v14, 4 }
 0x209   : > { %4887 = vst [vmem:[#allocation33_spill] sm:$0xff] %v4141_v16  ;;  %4888 = vst [vmem:[#allocation34_spill] sm:$0xff] %v4143_v34  ;;  %v4147_v36 = vadd.f32 %v2223_v5, %v2222_v47  ;;  %v2241_v19 = vrot.slane %v2240_v8, 1  ;;  %v2261_v20 = vsel %vm2075_vm1, %v4078_v37, 0.0  ;;  %v2262_v59 = vsel %vm2075_vm1, %v4081_v38, 0.0 }
 0x20a   : > { %4889 = vst [vmem:[#allocation35_spill] sm:$0xff] %v4145_v49  ;;  %v4153_v60 = vadd.f32 %v2232_v21, %v2231_v29  ;;  %v2249_v24 = vadd.f32 %v2248_v15, %v2247_v7  ;;  %v2256_v17 = vadd.f32 %v2255_v18, %v2254_v14  ;;  %v2263_v12 = vadd.f32 %v2262_v59, %v2261_v20 }
 0x20b   : > { %4890 = vst [vmem:[#allocation36_spill] sm:$0xff] %v4147_v36  ;;  %v4155_v6 = vadd.f32 %v2241_v19, %v2240_v8  ;;  %v2270_v26 = vsel %vm2075_vm1, %v4084_v39, 0.0  ;;  %v2271_v28 = vsel %vm2075_vm1, %v4087_v40, 0.0  ;;  %v2279_v51 = vsel %vm2075_vm1, %v4090_v41, 0.0 }
 0x20c   : > { %4891 = vst [vmem:[#allocation37_spill] sm:$0xff] %v4153_v60  ;;  %v2250_v37 = vrot.slane %v2249_v24, 1  ;;  %v2257_v30 = vrot.slane %v2256_v17, 2  ;;  %v2264_v33 = vrot.slane %v2263_v12, 4  ;;  %v2272_v38 = vadd.f32 %v2271_v28, %v2270_v26 }
 0x20d   : > { %4892 = vst [vmem:[#allocation38_spill] sm:$0xff] %v4155_v6  ;;  %v2280_v7 = vsel %vm2075_vm1, %v4093_v44, 0.0  ;;  %v2288_v61 = vsel %vm2075_vm1, %v4096_v48, 0.0  ;;  %v2289_v2 = vsel %vm2075_vm1, %v4099_v52, 0.0  ;;  %v2297_v39 = vsel %vm2075_vm1, %v4102_v53, 0.0 }
 0x20e   : > { %v4171_v40 = vadd.f32 %v2250_v37, %v2249_v24  ;;  %v2258_v35 = vadd.f32 %v2257_v30, %v2256_v17  ;;  %v2265_v41 = vadd.f32 %v2264_v33, %v2263_v12  ;;  %v2273_v31 = vrot.slane %v2272_v38, 4 }
 0x20f   : > { %v2281_v46 = vadd.f32 %v2280_v7, %v2279_v51  ;;  %v2290_v32 = vadd.f32 %v2289_v2, %v2288_v61  ;;  %v2298_v47 = vsel %vm2075_vm1, %v4105_v54, 0.0  ;;  %v2306_v44 = vsel %vm2075_vm1, %v4108_v55, 0.0 }
 0x210   : > { %4893 = vst [vmem:[#allocation39_spill] sm:$0xff] %v4171_v40  ;;  %v2259_v48 = vrot.slane %v2258_v35, 1  ;;  %v2266_v10 = vrot.slane %v2265_v41, 2  ;;  %v2274_v29 = vadd.f32 %v2273_v31, %v2272_v38  ;;  %v2299_v52 = vadd.f32 %v2298_v47, %v2297_v39 }
 0x211   : > { %v2282_v14 = vrot.slane %v2281_v46, 4  ;;  %v2291_v5 = vrot.slane %v2290_v32, 4  ;;  %v2307_v53 = vsel %vm2075_vm1, %v4111_v56, 0.0  ;;  %v2315_v8 = vsel %vm2075_vm1, %v4114_v57, 0.0 }
 0x212   : > { %v4181_v21 = vadd.f32 %v2259_v48, %v2258_v35  ;;  %v2267_v15 = vadd.f32 %v2266_v10, %v2265_v41  ;;  %v2275_v18 = vrot.slane %v2274_v29, 2  ;;  %v2300_v54 = vrot.slane %v2299_v52, 4 }
 0x213   : > { %v2283_v19 = vadd.f32 %v2282_v14, %v2281_v46  ;;  %v2292_v20 = vadd.f32 %v2291_v5, %v2290_v32  ;;  %v2308_v55 = vadd.f32 %v2307_v53, %v2306_v44  ;;  %v2316_v59 = vsel %vm2075_vm1, %v4117_v58, 0.0 }
 0x214   : > { %4894 = vst [vmem:[#allocation40_spill] sm:$0xff] %v4181_v21  ;;  %v2268_v24 = vrot.slane %v2267_v15, 1  ;;  %v2276_v17 = vadd.f32 %v2275_v18, %v2274_v29  ;;  %v2301_v12 = vadd.f32 %v2300_v54, %v2299_v52  ;;  %v2317_v26 = vadd.f32 %v2316_v59, %v2315_v8 }
 0x215   : > { %v2284_v28 = vrot.slane %v2283_v19, 2  ;;  %v2293_v56 = vrot.slane %v2292_v20, 2  ;;  %v2309_v51 = vrot.slane %v2308_v55, 4  ;;  %v2324_v57 = vsel %vm2075_vm1, %v4120_v63, 0.0 }
 0x216   : > { %v4187_v37 = vadd.f32 %v2268_v24, %v2267_v15  ;;  %v2277_v30 = vrot.slane %v2276_v17, 1  ;;  %v2302_v33 = vrot.slane %v2301_v12, 2  ;;  %v2318_v38 = vrot.slane %v2317_v26, 4 }
 0x217   : > { %v2285_v7 = vadd.f32 %v2284_v28, %v2283_v19  ;;  %v2294_v61 = vadd.f32 %v2293_v56, %v2292_v20  ;;  %v2310_v2 = vadd.f32 %v2309_v51, %v2308_v55  ;;  %v2325_v58 = vsel %vm2075_vm1, %v4123_v62, 0.0 }
 0x218   : > { %4895 = vst [vmem:[#allocation41_spill] sm:$0xff] %v4187_v37  ;;  %v4191_v39 = vadd.f32 %v2277_v30, %v2276_v17  ;;  %v2303_v35 = vadd.f32 %v2302_v33, %v2301_v12  ;;  %v2319_v41 = vadd.f32 %v2318_v38, %v2317_v26  ;;  %v2326_v31 = vadd.f32 %v2325_v58, %v2324_v57 }
 0x219   : > { %v2286_v46 = vrot.slane %v2285_v7, 1  ;;  %v2295_v32 = vrot.slane %v2294_v61, 1  ;;  %v2311_v47 = vrot.slane %v2310_v2, 2  ;;  %v2349_v63 = vsel %vm2075_vm1, %v4141_v16, -inf }
 0x21a   : > { %4896 = vst [vmem:[#allocation42_spill] sm:$0xff] %v4191_v39  ;;  %v2304_v44 = vrot.slane %v2303_v35, 1  ;;  %v2320_v48 = vrot.slane %v2319_v41, 2  ;;  %v2327_v10 = vrot.slane %v2326_v31, 4  ;;  %v2350_v29 = vsel %vm2075_vm1, %v4143_v34, -inf }
 0x21b   : > { %v4197_v52 = vadd.f32 %v2286_v46, %v2285_v7  ;;  %v4199_v62 = vadd.f32 %v2295_v32, %v2294_v61  ;;  %v2312_v14 = vadd.f32 %v2311_v47, %v2310_v2  ;;  %v2351_v5 = vsel %vm2075_vm1, %v4145_v49, -inf }
 0x21c   : > { %v4203_v53 = vadd.f32 %v2304_v44, %v2303_v35  ;;  %v2321_v8 = vadd.f32 %v2320_v48, %v2319_v41  ;;  %v2328_v15 = vadd.f32 %v2327_v10, %v2326_v31  ;;  %v2352_v18 = vsel %vm2075_vm1, %v4147_v36, -inf }
 0x21d   : > { %4897 = vst [vmem:[#allocation43_spill] sm:$0xff] %v4197_v52  ;;  %4898 = vst [vmem:[#allocation44_spill] sm:$0xff] %v4199_v62  ;;  %v2313_v54 = vrot.slane %v2312_v14, 1  ;;  %v2353_v19 = vsel %vm2075_vm1, %v4153_v60, -inf  ;;  %v2355_v20 = vsel %vm2075_vm1, %v4155_v6, -inf  ;;  %v2357_v55 = vsel %vm2075_vm1, %v4171_v40, -inf }
 0x21e   : > { %4899 = vst [vmem:[#allocation45_spill] sm:$0xff] %v4203_v53  ;;  %v2322_v59 = vrot.slane %v2321_v8, 1  ;;  %v2329_v24 = vrot.slane %v2328_v15, 2  ;;  %v2354_v17 = vmax.f32 %v2349_v63, %v2353_v19  ;;  %v2356_v12 = vmax.f32 %v2350_v29, %v2355_v20 }
 0x21f   : > { %v4213_v26 = vadd.f32 %v2313_v54, %v2312_v14  ;;  %v2358_v28 = vmax.f32 %v2351_v5, %v2357_v55  ;;  %v2359_v56 = vsel %vm2075_vm1, %v4181_v21, -inf  ;;  %v2361_v51 = vsel %vm2075_vm1, %v4187_v37, -inf }
 0x220   : > { %v4219_v57 = vadd.f32 %v2322_v59, %v2321_v8  ;;  %v2330_v30 = vadd.f32 %v2329_v24, %v2328_v15  ;;  %v2360_v33 = vmax.f32 %v2352_v18, %v2359_v56  ;;  %v2362_v38 = vmax.f32 %v2354_v17, %v2361_v51 }
 0x221   : > { %4900 = vst [vmem:[#allocation46_spill] sm:$0xff] %v4213_v26  ;;  %v2363_v7 = vsel %vm2075_vm1, %v4191_v39, -inf  ;;  %v2365_v61 = vsel %vm2075_vm1, %v4197_v52, -inf  ;;  %v2367_v2 = vsel %vm2075_vm1, %v4199_v62, -inf  ;;  %v2369_v31 = vsel %vm2075_vm1, %v4203_v53, -inf }
 0x222   : > { %4901 = vst [vmem:[#allocation47_spill] sm:$0xff] %v4219_v57  ;;  %v2331_v58 = vrot.slane %v2330_v30, 1  ;;  %v2364_v35 = vmax.f32 %v2356_v12, %v2363_v7  ;;  %v2366_v41 = vmax.f32 %v2358_v28, %v2365_v61  ;;  %v2368_v46 = vmax.f32 %v2360_v33, %v2367_v2 }
 0x223   : > { %v2370_v32 = vmax.f32 %v2362_v38, %v2369_v31  ;;  %v2371_v47 = vsel %vm2075_vm1, %v4213_v26, -inf  ;;  %v2373_v48 = vsel %vm2075_vm1, %v4219_v57, -inf }
 0x224   : > { %v4231_v63 = vadd.f32 %v2331_v58, %v2330_v30  ;;  %v2372_v44 = vmax.f32 %v2364_v35, %v2371_v47  ;;  %v2374_v10 = vmax.f32 %v2366_v41, %v2373_v48 }
 0x226   : > { %4902 = vst [vmem:[#allocation48_spill] sm:$0xff] %v4231_v63  ;;  %v2375_v29 = vsel %vm2075_vm1, %v4231_v63, -inf  ;;  %v2377_v5 = vmax.f32 %v2370_v32, %v2372_v44 }
 0x227   : > { %v2376_v14 = vmax.f32 %v2368_v46, %v2375_v29 }
 0x229   : > { %v2378_v8 = vmax.f32 %v2374_v10, %v2376_v14 }
 0x22b   : > { %v2379_v15 = vmax.f32 %v2377_v5, %v2378_v8 }
 0x22d   : > { %v2380_v18 = vsub.f32 %v4141_v16, %v2379_v15  ;;  %v2381_v54 = vsub.f32 %v4143_v34, %v2379_v15  ;;  %v2382_v19 = vsub.f32 %v4145_v49, %v2379_v15  ;;  %v2383_v20 = vsub.f32 %v4147_v36, %v2379_v15  ;;  %v4910_v36 = vld [vmem:[#allocation12_spill] sm:$0xff]  ;;  %v4913_v16 = vld [vmem:[#allocation10_spill] sm:$0xff] }
 0x22e   : > { %v2384_v55 = vsub.f32 %v4153_v60, %v2379_v15  ;;  %v2385_v59 = vsub.f32 %v4155_v6, %v2379_v15  ;;  %v2386_v24 = vsub.f32 %v4171_v40, %v2379_v15  ;;  %v2387_v56 = vsub.f32 %v4181_v21, %v2379_v15  ;;  %v4909_v6 = vld [vmem:[#allocation7_spill] sm:$0xff] }
 0x22f   : > { %v2396_v17 = vmul.f32 1.442695, %v2380_v18  ;;  %v2398_v12 = vmul.f32 1.442695, %v2381_v54  ;;  %v2400_v28 = vmul.f32 1.442695, %v2382_v19  ;;  %v2388_v30 = vsub.f32 %v4187_v37, %v2379_v15 }
 0x230   : > { %v2402_v51 = vmul.f32 1.442695, %v2383_v20  ;;  %v2404_v33 = vmul.f32 1.442695, %v2384_v55  ;;  %v2389_v38 = vsub.f32 %v4191_v39, %v2379_v15  ;;  %v2406_v7 = vmul.f32 1.442695, %v2385_v59 }
 0x231   : > { %3556 = vpow2.f32 %v2396_v17  ;;  %v2390_v61 = vsub.f32 %v4197_v52, %v2379_v15  ;;  %v2408_v2 = vmul.f32 1.442695, %v2386_v24  ;;  %v2391_v58 = vsub.f32 %v4199_v62, %v2379_v15  ;;  %v4907_v52 = vld [vmem:[#allocation5_spill] sm:$0xff]  ;;  %v4908_v37 = vld [vmem:[#allocation11_spill] sm:$0xff] }
 0x232   : > { %3558 = vpow2.f32 %v2398_v12  ;;  %v2410_v35 = vmul.f32 1.442695, %v2387_v56  ;;  %v2392_v41 = vsub.f32 %v4203_v53, %v2379_v15  ;;  %v2412_v31 = vmul.f32 1.442695, %v2388_v30 }
 0x233   : > { %3560 = vpow2.f32 %v2400_v28  ;;  %v2393_v46 = vsub.f32 %v4213_v26, %v2379_v15  ;;  %v2414_v32 = vmul.f32 1.442695, %v2389_v38  ;;  %v2394_v47 = vsub.f32 %v4219_v57, %v2379_v15 }
 0x234   : > { %3562 = vpow2.f32 %v2402_v51  ;;  %v2416_v44 = vmul.f32 1.442695, %v2390_v61  ;;  %v2395_v48 = vsub.f32 %v4231_v63, %v2379_v15  ;;  %v2418_v10 = vmul.f32 1.442695, %v2391_v58 }
 0x235   : > { %3564 = vpow2.f32 %v2404_v33  ;;  %v2420_v29 = vmul.f32 1.442695, %v2392_v41  ;;  %v2422_v14 = vmul.f32 1.442695, %v2393_v46  ;;  %v2424_v8 = vmul.f32 1.442695, %v2394_v47 }
 0x236   : > { %3566 = vpow2.f32 %v2406_v7  ;;  %v2426_v54 = vmul.f32 1.442695, %v2395_v48 }
 0x237   : > { %3568 = vpow2.f32 %v2408_v2 }
 0x238   : > { %3570 = vpow2.f32 %v2410_v35 }
 0x239   : > { %3572 = vpow2.f32 %v2412_v31 }
 0x23a   : > { %3574 = vpow2.f32 %v2414_v32 }
 0x23b   : > { %v4253_v5 = vpop.eup %3556  ;;  %3576 = vpow2.f32 %v2416_v44 }
 0x23c   : > { %v4255_v18 = vpop.eup %3558  ;;  %3578 = vpow2.f32 %v2418_v10 }
 0x23d   : > { %v4257_v19 = vpop.eup %3560  ;;  %3580 = vpow2.f32 %v2420_v29  ;;  %v2444_v15 = vrot.slane %v4255_v18, 7 }
 0x23e   : > { %v4260_v20 = vpop.eup %3562  ;;  %3582 = vpow2.f32 %v2422_v14  ;;  %v2447_v55 = vrot.slane %v4257_v19, 6 }
 0x23f   : > { %v4263_v59 = vpop.eup %3564  ;;  %3584 = vpow2.f32 %v2424_v8  ;;  %v2446_v24 = vsel %vm2445_vm2, %v2444_v15, %v4253_v5  ;;  %v2450_v17 = vrot.slane %v4260_v20, 5 }
 0x240   : > { %v4268_v12 = vpop.eup %3566  ;;  %3586 = vpow2.f32 %v2426_v54  ;;  %v2449_v28 = vsel %vm2448_vm3, %v2447_v55, %v2446_v24  ;;  %v2453_v56 = vrot.slane %v4263_v59, 4 }
 0x241   : > { %v4272_v51 = vpop.eup %3568  ;;  %v2452_v30 = vsel %vm2451_vm4, %v2450_v17, %v2449_v28  ;;  %v2456_v33 = vrot.slane %v4268_v12, 3 }
 0x242   : > { %v4276_v38 = vpop.eup %3570  ;;  %v2455_v7 = vsel %vm2454_vm5, %v2453_v56, %v2452_v30  ;;  %v2459_v35 = vrot.slane %v4272_v51, 2 }
 0x243   : > { %v4279_v61 = vpop.eup %3572  ;;  %v2458_v2 = vsel %vm2457_vm6, %v2456_v33, %v2455_v7  ;;  %v2462_v48 = vrot.slane %v4276_v38, 1 }
 0x244   : > { %v4282_v58 = vpop.eup %3574  ;;  %v2461_v32 = vsel %vm2460_vm7, %v2459_v35, %v2458_v2 }
 0x245   : > { %v3577_v41 = vpop.eup %3576  ;;  %v2465_v31 = vrot.slane %v4282_v58, 7  ;;  %v2464_v55 = vsel %vm2463_vm8, %v2462_v48, %v2461_v32 }
 0x246   : > { %v3579_v46 = vpop.eup %3578  ;;  %v2467_v47 = vrot.slane %v3577_v41, 6  ;;  %v2481_v35 = vsel %vm2075_vm1, %v2464_v55, 0.0 }
 0x247   : > { %v3581_v44 = vpop.eup %3580  ;;  %v2466_v10 = vsel %vm2445_vm2, %v2465_v31, %v4279_v61  ;;  %v2469_v29 = vrot.slane %v3579_v46, 5 }
 0x248   : > { %v3583_v14 = vpop.eup %3582  ;;  %v2468_v8 = vsel %vm2448_vm3, %v2467_v47, %v2466_v10  ;;  %v2471_v54 = vrot.slane %v3581_v44, 4 }
 0x249   : > { %v3585_v15 = vpop.eup %3584  ;;  %v2470_v24 = vsel %vm2451_vm4, %v2469_v29, %v2468_v8  ;;  %v2473_v17 = vrot.slane %v3583_v14, 3 }
 0x24a   : > { %v3587_v28 = vpop.eup %3586  ;;  %v2472_v56 = vsel %vm2454_vm5, %v2471_v54, %v2470_v24  ;;  %v2475_v30 = vrot.slane %v3585_v15, 2  ;;  %v2491_v54 = vlaneseq }
 0x24b   : > { %v2474_v33 = vsel %vm2457_vm6, %v2473_v17, %v2472_v56  ;;  %v2477_v7 = vrot.slane %v3587_v28, 1 }
 0x24c   : > { %v2476_v2 = vsel %vm2460_vm7, %v2475_v30, %v2474_v33  ;;  %v2492_v24 = vshrl.u32 %v2491_v54, 7 }
 0x24d   : > { %v2478_v31 = vsel %vm2463_vm8, %v2477_v7, %v2476_v2 }
 0x24e   : > { %v2482_v47 = vsel %vm2075_vm1, %v2478_v31, 0.0  ;;  %v4299_v17 = vsub.s32 0, %v2492_v24 }
 0x24f   : > { %v2483_v10 = vadd.f32 %v2482_v47, %v2481_v35 }
 0x250   : > { %4903 = vst [vmem:[#allocation49_spill] sm:$0xff] %v4299_v17 }
 0x251   : > { %v2484_v32 = vrot.slane %v2483_v10, 4 }
 0x253   : > { %v2485_v48 = vadd.f32 %v2484_v32, %v2483_v10 }
 0x255   : > { %v2486_v29 = vrot.slane %v2485_v48, 2 }
 0x257   : > { %v2487_v8 = vadd.f32 %v2486_v29, %v2485_v48 }
 0x259   : > { %v2488_v63 = vrot.slane %v2487_v8, 1 }
 0x25b   : > { %v2489_v57 = vadd.f32 %v2488_v63, %v2487_v8 }
 0x25d   : > { %3588 = vrcp.f32 %v2489_v57 }
 0x267   : > { %v3589_v56 = vpop.eup %3588 }
 0x268   : > { %v2494_v30 = vrot.slane %v3589_v56, %v4299_v17 }
 0x26a   : > { %v2495_v55 = vmul.f32 %v4253_v5, %v2494_v30  ;;  %v2496_v33 = vmul.f32 %v4255_v18, %v2494_v30  ;;  %v2497_v7 = vmul.f32 %v4257_v19, %v2494_v30  ;;  %v2505_v2 = vmul.f32 %v3577_v41, %v2494_v30 }
 0x26b   : > { %v2506_v35 = vmul.f32 %v3579_v46, %v2494_v30  ;;  %v2498_v31 = vmul.f32 %v4260_v20, %v2494_v30  ;;  %v2507_v47 = vmul.f32 %v3581_v44, %v2494_v30  ;;  %v2508_v63 = vmul.f32 %v3583_v14, %v2494_v30 }
 0x26c   : > { %v2499_v57 = vmul.f32 %v4263_v59, %v2494_v30  ;;  %v2500_v10 = vmul.f32 %v4268_v12, %v2494_v30  ;;  %v2509_v32 = vmul.f32 %v3585_v15, %v2494_v30  ;;  %v2510_v48 = vmul.f32 %v3587_v28, %v2494_v30 }
 0x26d   : > { %v2514_v29 = vrot.slane %v2495_v55, %v4299_v17  ;;  %v2518_v5 = vrot.slane %v2496_v33, %v4299_v17  ;;  %v2522_v18 = vrot.slane %v2497_v7, %v4299_v17  ;;  %v2501_v19 = vmul.f32 %v4272_v51, %v2494_v30 }
 0x26e   : > { %v2554_v41 = vrot.slane %v2505_v2, %v4299_v17  ;;  %v2558_v20 = vrot.slane %v2506_v35, %v4299_v17  ;;  %v2502_v46 = vmul.f32 %v4276_v38, %v2494_v30  ;;  %v2526_v59 = vrot.slane %v2498_v31, %v4299_v17 }
 0x26f   : > { %v2562_v12 = vrot.slane %v2507_v47, %v4299_v17  ;;  %v2566_v44 = vrot.slane %v2508_v63, %v4299_v17  ;;  %v2530_v14 = vrot.slane %v2499_v57, %v4299_v17  ;;  %v2534_v15 = vrot.slane %v2500_v10, %v4299_v17 }
 0x270   : > { %v2570_v28 = vrot.slane %v2509_v32, %v4299_v17  ;;  %v2574_v51 = vrot.slane %v2510_v48, %v4299_v17  ;;  %v2575_v8 = vmul.f32 %v2514_v29, %v3933_v1  ;;  %v2576_v54 = vmul.f32 %v3931_v0, %v2514_v29  ;;  %v4904_v32 = vld [vmem:[#allocation30_spill] sm:$0xff] }
 0x271   : > { %v2577_v38 = vmul.f32 %v2518_v5, %v3945_v9  ;;  %v2579_v24 = vmul.f32 %v2522_v18, %v3937_v3  ;;  %v4327_v56 = vmul.f32 %v2554_v41, %v4016_v25  ;;  %v4330_v55 = vmul.f32 %v4011_v22, %v2554_v41  ;;  %v4905_v29 = vld [vmem:[#allocation6_spill] sm:$0xff] }
 0x272   : > { %v4333_v33 = vmul.f32 %v2558_v20, %v4019_v27  ;;  %v4336_v7 = vmul.f32 %v4013_v23, %v2558_v20  ;;  %v4339_v2 = vmul.f32 %v2562_v12, %v4032_v45  ;;  %v4342_v35 = vmul.f32 %v4027_v42, %v2562_v12  ;;  %v4906_v20 = vld [vmem:[#allocation8_spill] sm:$0xff] }
 0x273   : > { %v4345_v31 = vmul.f32 %v2566_v44, %v4035_v50  ;;  %v4348_v47 = vmul.f32 %v4029_v43, %v2566_v44  ;;  %v4351_v63 = vmul.f32 %v2570_v28, %v4048_v11  ;;  %v4354_v57 = vmul.f32 %v4043_v4, %v2570_v28 }
 0x274   : > { %v4357_v10 = vmul.f32 %v2574_v51, %v4051_v13  ;;  %v4360_v48 = vmul.f32 %v4904_v32, %v2574_v51  ;;  %v2578_v41 = vmul.f32 %v4905_v29, %v2518_v5  ;;  %v2581_v12 = vmul.f32 %v2526_v59, %v4906_v20  ;;  %v4914_v32 = vld [vmem:[#allocation16_spill] sm:$0xff]  ;;  %v4916_v13 = vld [vmem:[#allocation19_spill] sm:$0xff] }
 0x275   : > { %v2607_v26 = vsel %vm2075_vm1, %v2575_v8, 0.0  ;;  %v2608_v44 = vsel %vm2075_vm1, %v2577_v38, 0.0  ;;  %v2503_v53 = vmul.f32 %v4279_v61, %v2494_v30  ;;  %v2538_v28 = vrot.slane %v2501_v19, %v4299_v17 }
 0x276   : > { %v2609_v62 = vadd.f32 %v2608_v44, %v2607_v26  ;;  %v2580_v39 = vmul.f32 %v4907_v52, %v2522_v18  ;;  %v2583_v21 = vmul.f32 %v2530_v14, %v4908_v37  ;;  %v2610_v51 = vsel %vm2075_vm1, %v2579_v24, 0.0  ;;  %v4911_v24 = vld [vmem:[#allocation9_spill] sm:$0xff] }
 0x277   : > { %v2504_v40 = vmul.f32 %v4282_v58, %v2494_v30  ;;  %v2542_v5 = vrot.slane %v2502_v46, %v4299_v17  ;;  %v2582_v60 = vmul.f32 %v4909_v6, %v2526_v59  ;;  %v2585_v38 = vmul.f32 %v2534_v15, %v4910_v36  ;;  %v4912_v58 = vld [vmem:[#allocation15_spill] sm:$0xff] }
 0x278   : > { %v2611_v8 = vadd.f32 %v2610_v51, %v2609_v62  ;;  %v2612_v61 = vsel %vm2075_vm1, %v2581_v12, 0.0  ;;  %v2638_v26 = vsel %vm2075_vm1, %v2576_v54, 0.0  ;;  %v2639_v19 = vsel %vm2075_vm1, %v2578_v41, 0.0 }
 0x279   : > { %v2546_v18 = vrot.slane %v2503_v53, %v4299_v17  ;;  %v2640_v49 = vadd.f32 %v2639_v19, %v2638_v26  ;;  %v2584_v34 = vmul.f32 %v4911_v24, %v2530_v14  ;;  %v2587_v30 = vmul.f32 %v2538_v28, %v4912_v58  ;;  %v4915_v26 = vld [vmem:[#allocation13_spill] sm:$0xff] }
 0x27a   : > { %v2613_v44 = vadd.f32 %v2612_v61, %v2611_v8  ;;  %v2614_v46 = vsel %vm2075_vm1, %v2583_v21, 0.0  ;;  %v2641_v62 = vsel %vm2075_vm1, %v2580_v39, 0.0  ;;  %v2550_v59 = vrot.slane %v2504_v40, %v4299_v17 }
 0x27b   : > { %v2642_v12 = vadd.f32 %v2641_v62, %v2640_v49  ;;  %v2586_v54 = vmul.f32 %v4913_v16, %v2534_v15  ;;  %v2589_v41 = vmul.f32 %v2542_v5, %v4914_v32  ;;  %v2616_v53 = vsel %vm2075_vm1, %v2585_v38, 0.0  ;;  %v4918_v62 = vld [vmem:[#allocation20_spill] sm:$0xff] }
 0x27c   : > { %v2615_v51 = vadd.f32 %v2614_v46, %v2613_v44  ;;  %v2643_v8 = vsel %vm2075_vm1, %v2582_v60, 0.0  ;;  %v2588_v19 = vmul.f32 %v4915_v26, %v2538_v28  ;;  %v2591_v21 = vmul.f32 %v2546_v18, %v4916_v13  ;;  %v4917_v46 = vld [vmem:[#allocation14_spill] sm:$0xff] }
 0x27d   : > { %v2644_v14 = vadd.f32 %v2643_v8, %v2642_v12  ;;  %v2618_v39 = vsel %vm2075_vm1, %v2587_v30, 0.0  ;;  %v2645_v40 = vsel %vm2075_vm1, %v2584_v34, 0.0  ;;  %v2590_v15 = vmul.f32 %v4917_v46, %v2542_v5 }
 0x27e   : > { %v2617_v61 = vadd.f32 %v2616_v53, %v2615_v51  ;;  %v2593_v17 = vmul.f32 %v2550_v59, %v4918_v62  ;;  %v2620_v38 = vsel %vm2075_vm1, %v2589_v41, 0.0  ;;  %v2647_v60 = vsel %vm2075_vm1, %v2586_v54, 0.0  ;;  %v4919_v53 = vld [vmem:[#allocation17_spill] sm:$0xff] }
 0x27f   : > { %v2646_v49 = vadd.f32 %v2645_v40, %v2644_v14  ;;  %v2592_v28 = vmul.f32 %v4919_v53, %v2546_v18  ;;  %v2622_v8 = vsel %vm2075_vm1, %v2591_v21, 0.0  ;;  %v2649_v30 = vsel %vm2075_vm1, %v2588_v19, 0.0 }
 0x280   : > { %v2619_v44 = vadd.f32 %v2618_v39, %v2617_v61  ;;  %v4920_v61 = vld [vmem:[#allocation18_spill] sm:$0xff]  ;;  %v2624_v5 = vsel %vm2075_vm1, %v2593_v17, 0.0  ;;  %v2651_v39 = vsel %vm2075_vm1, %v2590_v15, 0.0  ;;  %v2626_v54 = vsel %vm2075_vm1, %v4327_v56, 0.0 }
 0x281   : > { %v2648_v12 = vadd.f32 %v2647_v60, %v2646_v49  ;;  %v2594_v14 = vmul.f32 %v4920_v61, %v2550_v59  ;;  %v2628_v19 = vsel %vm2075_vm1, %v4333_v33, 0.0  ;;  %v2630_v17 = vsel %vm2075_vm1, %v4339_v2, 0.0 }
 0x282   : > { %v2621_v51 = vadd.f32 %v2620_v38, %v2619_v44  ;;  %v2653_v44 = vsel %vm2075_vm1, %v2592_v28, 0.0  ;;  %v2632_v56 = vsel %vm2075_vm1, %v4345_v31, 0.0  ;;  %v2634_v28 = vsel %vm2075_vm1, %v4351_v63, 0.0 }
 0x283   : > { %v2650_v34 = vadd.f32 %v2649_v30, %v2648_v12  ;;  %v2655_v21 = vsel %vm2075_vm1, %v2594_v14, 0.0  ;;  %v2667_v63 = vsel %vm2075_vm1, %v4360_v48, 0.0 }
 0x284   : > { %v2623_v4 = vadd.f32 %v2622_v8, %v2621_v51  ;;  %v2659_v51 = vsel %vm2075_vm1, %v4336_v7, 0.0  ;;  %v2661_v8 = vsel %vm2075_vm1, %v4342_v35, 0.0  ;;  %v2665_v7 = vsel %vm2075_vm1, %v4354_v57, 0.0 }
 0x285   : > { %v2652_v41 = vadd.f32 %v2651_v39, %v2650_v34  ;;  %v2663_v34 = vsel %vm2075_vm1, %v4348_v47, 0.0 }
 0x286   : > { %v2625_v40 = vadd.f32 %v2624_v5, %v2623_v4  ;;  %v2657_v4 = vsel %vm2075_vm1, %v4330_v55, 0.0  ;;  %v2636_v55 = vsel %vm2075_vm1, %v4357_v10, 0.0 }
 0x287   : > { %v2654_v49 = vadd.f32 %v2653_v44, %v2652_v41 }
 0x288   : > { %v2627_v18 = vadd.f32 %v2626_v54, %v2625_v40 }
 0x289   : > { %v2656_v59 = vadd.f32 %v2655_v21, %v2654_v49 }
 0x28a   : > { %v2629_v38 = vadd.f32 %v2628_v19, %v2627_v18 }
 0x28b   : > { %v2658_v60 = vadd.f32 %v2657_v4, %v2656_v59 }
 0x28c   : > { %v2631_v15 = vadd.f32 %v2630_v17, %v2629_v38 }
 0x28d   : > { %v2660_v33 = vadd.f32 %v2659_v51, %v2658_v60 }
 0x28e   : > { %v2633_v12 = vadd.f32 %v2632_v56, %v2631_v15 }
 0x28f   : > { %v2662_v30 = vadd.f32 %v2661_v8, %v2660_v33 }
 0x290   : > { %v2635_v2 = vadd.f32 %v2634_v28, %v2633_v12 }
 0x291   : > { %v2664_v14 = vadd.f32 %v2663_v34, %v2662_v30 }
 0x292   : > { %v2637_v31 = vadd.f32 %v2636_v55, %v2635_v2 }
 0x293   : > { %v2666_v5 = vadd.f32 %v2665_v7, %v2664_v14 }
 0x294   : > { %v2669_v39 = vmul.f32 %v2637_v31, %v2637_v31 }
 0x295   : > { %v2668_v40 = vadd.f32 %v2667_v63, %v2666_v5 }
 0x296   : > { %v2671_v41 = vsel %vm2075_vm1, %v2669_v39, 0.0 }
 0x297   : > { %v2670_v35 = vmul.f32 %v2668_v40, %v2668_v40 }
 0x299   : > { %v2672_v54 = vsel %vm2075_vm1, %v2670_v35, 0.0 }
 0x29a   : > { %v2673_v10 = vadd.f32 %v2672_v54, %v2671_v41 }
 0x29c   : > { %v2674_v44 = vrot.slane %v2673_v10, 4 }
 0x29e   : > { %v2675_v18 = vadd.f32 %v2674_v44, %v2673_v10 }
 0x2a0   : > { %v2676_v47 = vrot.slane %v2675_v18, 2 }
 0x2a2   : > { %v2677_v49 = vadd.f32 %v2676_v47, %v2675_v18 }
 0x2a4   : > { %v2678_v19 = vrot.slane %v2677_v49, 1 }
 0x2a6   : > { %v2679_v21 = vadd.f32 %v2678_v19, %v2677_v49 }
 0x2a8   : > { %3590 = vrsqrt.f32 %v2679_v21  ;;  %v2684_v57 = vadd.f32 1.0, %v2679_v21 }
 0x2aa   : > { %3592 = vrcp.f32 %v2684_v57 }
 0x2b2   : > { %v3591_v38 = vpop.eup %3590 }
 0x2b3   : > { %v2681_v59 = vmul.f32 %v3591_v38, %v2679_v21 }
 0x2b4   : > { %v3593_v4 = vpop.eup %3592 }
 0x2b5   : > { %v2682_v17 = vmul.f32 %v2681_v59, %v2637_v31  ;;  %v2683_v48 = vmul.f32 %v2681_v59, %v2668_v40  ;;  %v4921_v59 = vld [vmem:[#allocation29_spill] sm:$0xff] }
 0x2b7   : > { %v2686_v15 = vmul.f32 %v3593_v4, %v2682_v17  ;;  %v2687_v60 = vmul.f32 %v3593_v4, %v2683_v48  ;;  %v4922_v48 = vld [vmem:[#allocation32_spill] sm:$0xff] }
 0x2b9   : > { %v2688_v56 = vmul.f32 %v2686_v15, %v3933_v1  ;;  %v2689_v51 = vmul.f32 %v3931_v0, %v2687_v60  ;;  %v2690_v12 = vmul.f32 %v2686_v15, %v3945_v9  ;;  %v2691_v33 = vmul.f32 %v4905_v29, %v2687_v60 }
 0x2ba   : > { %v2692_v28 = vmul.f32 %v2686_v15, %v3937_v3  ;;  %v2693_v8 = vmul.f32 %v4907_v52, %v2687_v60  ;;  %v2694_v2 = vmul.f32 %v2686_v15, %v4906_v20  ;;  %v2695_v30 = vmul.f32 %v4909_v6, %v2687_v60 }
 0x2bb   : > { %v2696_v55 = vmul.f32 %v2686_v15, %v4908_v37  ;;  %v2697_v34 = vmul.f32 %v4911_v24, %v2687_v60  ;;  %v2698_v31 = vmul.f32 %v2686_v15, %v4910_v36  ;;  %v2699_v14 = vmul.f32 %v4913_v16, %v2687_v60 }
 0x2bc   : > { %v2700_v7 = vmul.f32 %v2686_v15, %v4912_v58  ;;  %v2701_v5 = vmul.f32 %v4915_v26, %v2687_v60  ;;  %v2702_v39 = vmul.f32 %v2686_v15, %v4914_v32  ;;  %v2703_v63 = vmul.f32 %v4917_v46, %v2687_v60 }
 0x2bd   : > { %v4447_v40 = vmul.f32 %v2686_v15, %v4916_v13  ;;  %v4450_v35 = vmul.f32 %v4919_v53, %v2687_v60  ;;  %v4453_v41 = vmul.f32 %v2686_v15, %v4918_v62  ;;  %v4456_v54 = vmul.f32 %v4920_v61, %v2687_v60 }
 0x2be   : > { %v4459_v10 = vmul.f32 %v2686_v15, %v4016_v25  ;;  %v4462_v44 = vmul.f32 %v4011_v22, %v2687_v60  ;;  %v4465_v18 = vmul.f32 %v2686_v15, %v4019_v27  ;;  %v4468_v47 = vmul.f32 %v4013_v23, %v2687_v60 }
 0x2bf   : > { %v4471_v49 = vmul.f32 %v2686_v15, %v4032_v45  ;;  %v4474_v19 = vmul.f32 %v4027_v42, %v2687_v60  ;;  %v4477_v21 = vmul.f32 %v2686_v15, %v4035_v50  ;;  %v4480_v57 = vmul.f32 %v4029_v43, %v2687_v60  ;;  %v4923_v45 = vld [vmem:[#allocation30_spill] sm:$0xff] }
 0x2c0   : > { %v4483_v38 = vmul.f32 %v2686_v15, %v4048_v11  ;;  %v4486_v17 = vmul.f32 %v4921_v59, %v2687_v60  ;;  %v4489_v4 = vmul.f32 %v2686_v15, %v4922_v48  ;;  %v4492_v23 = vmul.f32 %v4923_v45, %v2687_v60 }
 0x2c1   : > { %v2720_v42 = vsel %vm2075_vm1, %v2688_v56, 0.0  ;;  %v2721_v50 = vsel %vm2075_vm1, %v2689_v51, 0.0  ;;  %v2729_v27 = vsel %vm2075_vm1, %v2690_v12, 0.0  ;;  %v2730_v43 = vsel %vm2075_vm1, %v2691_v33, 0.0 }
 0x2c2   : > { %v2722_v22 = vadd.f32 %v2721_v50, %v2720_v42  ;;  %v2731_v11 = vadd.f32 %v2730_v43, %v2729_v27  ;;  %v2738_v25 = vsel %vm2075_vm1, %v2692_v28, 0.0  ;;  %v2739_v59 = vsel %vm2075_vm1, %v2693_v8, 0.0 }
 0x2c3   : > { %v2740_v61 = vadd.f32 %v2739_v59, %v2738_v25  ;;  %v2747_v15 = vsel %vm2075_vm1, %v2694_v2, 0.0  ;;  %v2748_v60 = vsel %vm2075_vm1, %v2695_v30, 0.0  ;;  %v2756_v45 = vsel %vm2075_vm1, %v2696_v55, 0.0 }
 0x2c4   : > { %v2723_v56 = vrot.slane %v2722_v22, 4  ;;  %v2732_v48 = vrot.slane %v2731_v11, 4  ;;  %v2749_v51 = vadd.f32 %v2748_v60, %v2747_v15  ;;  %v2757_v12 = vsel %vm2075_vm1, %v2697_v34, 0.0 }
 0x2c5   : > { %v2741_v62 = vrot.slane %v2740_v61, 4  ;;  %v2758_v33 = vadd.f32 %v2757_v12, %v2756_v45  ;;  %v2765_v27 = vsel %vm2075_vm1, %v2698_v31, 0.0  ;;  %v2766_v42 = vsel %vm2075_vm1, %v2699_v14, 0.0 }
 0x2c6   : > { %v2724_v43 = vadd.f32 %v2723_v56, %v2722_v22  ;;  %v2733_v50 = vadd.f32 %v2732_v48, %v2731_v11  ;;  %v2750_v25 = vrot.slane %v2749_v51, 4  ;;  %v2767_v28 = vadd.f32 %v2766_v42, %v2765_v27 }
 0x2c7   : > { %v2742_v8 = vadd.f32 %v2741_v62, %v2740_v61  ;;  %v2759_v2 = vrot.slane %v2758_v33, 4  ;;  %v2774_v30 = vsel %vm2075_vm1, %v2700_v7, 0.0  ;;  %v2775_v55 = vsel %vm2075_vm1, %v2701_v5, 0.0 }
 0x2c8   : > { %v2725_v59 = vrot.slane %v2724_v43, 2  ;;  %v2734_v15 = vrot.slane %v2733_v50, 2  ;;  %v2751_v60 = vadd.f32 %v2750_v25, %v2749_v51  ;;  %v2768_v34 = vrot.slane %v2767_v28, 4 }
 0x2c9   : > { %v2743_v53 = vrot.slane %v2742_v8, 2  ;;  %v2760_v45 = vadd.f32 %v2759_v2, %v2758_v33  ;;  %v2776_v12 = vadd.f32 %v2775_v55, %v2774_v30  ;;  %v2783_v31 = vsel %vm2075_vm1, %v2702_v39, 0.0 }
 0x2ca   : > { %v2726_v14 = vadd.f32 %v2725_v59, %v2724_v43  ;;  %v2735_v22 = vadd.f32 %v2734_v15, %v2733_v50  ;;  %v2752_v11 = vrot.slane %v2751_v60, 2  ;;  %v2769_v48 = vadd.f32 %v2768_v34, %v2767_v28 }
 0x2cb   : > { %v2744_v56 = vadd.f32 %v2743_v53, %v2742_v8  ;;  %v2761_v62 = vrot.slane %v2760_v45, 2  ;;  %v2777_v61 = vrot.slane %v2776_v12, 4  ;;  %v2784_v7 = vsel %vm2075_vm1, %v2703_v63, 0.0 }
 0x2cc   : > { %v2727_v27 = vrot.slane %v2726_v14, 1  ;;  %v2736_v5 = vrot.slane %v2735_v22, 1  ;;  %v2753_v42 = vadd.f32 %v2752_v11, %v2751_v60  ;;  %v2770_v13 = vrot.slane %v2769_v48, 2 }
 0x2cd   : > { %v2745_v51 = vrot.slane %v2744_v56, 1  ;;  %v2762_v25 = vadd.f32 %v2761_v62, %v2760_v45  ;;  %v2778_v46 = vadd.f32 %v2777_v61, %v2776_v12  ;;  %v2785_v33 = vadd.f32 %v2784_v7, %v2783_v31 }
 0x2ce   : > { %v4510_v2 = vadd.f32 %v2727_v27, %v2726_v14  ;;  %v4512_v39 = vadd.f32 %v2736_v5, %v2735_v22  ;;  %v2754_v43 = vrot.slane %v2753_v42, 1  ;;  %v2771_v50 = vadd.f32 %v2770_v13, %v2769_v48 }
 0x2cf   : > { %v4514_v28 = vadd.f32 %v2745_v51, %v2744_v56  ;;  %v2763_v53 = vrot.slane %v2762_v25, 1  ;;  %v2779_v8 = vrot.slane %v2778_v46, 2  ;;  %v2786_v30 = vrot.slane %v2785_v33, 4 }
 0x2d0   : > { %v4516_v63 = vadd.f32 %v2754_v43, %v2753_v42  ;;  %v2772_v55 = vrot.slane %v2771_v50, 1  ;;  %v2792_v59 = vsel %vm2075_vm1, %v4447_v40, 0.0  ;;  %v2793_v15 = vsel %vm2075_vm1, %v4450_v35, 0.0 }
 0x2d1   : > { %v4522_v60 = vadd.f32 %v2763_v53, %v2762_v25  ;;  %v2780_v34 = vadd.f32 %v2779_v8, %v2778_v46  ;;  %v2787_v45 = vadd.f32 %v2786_v30, %v2785_v33  ;;  %v2794_v12 = vadd.f32 %v2793_v15, %v2792_v59 }
 0x2d2   : > { %v4524_v13 = vadd.f32 %v2772_v55, %v2771_v50  ;;  %v2801_v31 = vsel %vm2075_vm1, %v4453_v41, 0.0  ;;  %v2802_v14 = vsel %vm2075_vm1, %v4456_v54, 0.0  ;;  %v2810_v22 = vsel %vm2075_vm1, %v4459_v10, 0.0 }
 0x2d3   : > { %v2781_v40 = vrot.slane %v2780_v34, 1  ;;  %v2788_v11 = vrot.slane %v2787_v45, 2  ;;  %v2795_v48 = vrot.slane %v2794_v12, 4  ;;  %v2803_v35 = vadd.f32 %v2802_v14, %v2801_v31 }
 0x2d4   : > { %v2811_v46 = vsel %vm2075_vm1, %v4462_v44, 0.0  ;;  %v2819_v56 = vsel %vm2075_vm1, %v4465_v18, 0.0  ;;  %v2820_v62 = vsel %vm2075_vm1, %v4468_v47, 0.0  ;;  %v2828_v41 = vsel %vm2075_vm1, %v4471_v49, 0.0 }
 0x2d5   : > { %v4540_v54 = vadd.f32 %v2781_v40, %v2780_v34  ;;  %v2789_v61 = vadd.f32 %v2788_v11, %v2787_v45  ;;  %v2796_v10 = vadd.f32 %v2795_v48, %v2794_v12  ;;  %v2804_v7 = vrot.slane %v2803_v35, 4 }
 0x2d6   : > { %v2812_v27 = vadd.f32 %v2811_v46, %v2810_v22  ;;  %v2821_v5 = vadd.f32 %v2820_v62, %v2819_v56  ;;  %v2829_v42 = vsel %vm2075_vm1, %v4474_v19, 0.0  ;;  %v2837_v44 = vsel %vm2075_vm1, %v4477_v21, 0.0 }
 0x2d7   : > { %v2790_v18 = vrot.slane %v2789_v61, 1  ;;  %v2797_v51 = vrot.slane %v2796_v10, 2  ;;  %v2805_v25 = vadd.f32 %v2804_v7, %v2803_v35  ;;  %v2830_v47 = vadd.f32 %v2829_v42, %v2828_v41 }
 0x2d8   : > { %v2813_v33 = vrot.slane %v2812_v27, 4  ;;  %v2822_v43 = vrot.slane %v2821_v5, 4  ;;  %v2838_v49 = vsel %vm2075_vm1, %v4480_v57, 0.0  ;;  %v2846_v50 = vsel %vm2075_vm1, %v4483_v38, 0.0 }
 0x2d9   : > { %v2791_v53 = vadd.f32 %v2790_v18, %v2789_v61  ;;  %v2798_v8 = vadd.f32 %v2797_v51, %v2796_v10  ;;  %v2806_v30 = vrot.slane %v2805_v25, 2  ;;  %v2831_v55 = vrot.slane %v2830_v47, 4 }
 0x2da   : > { %v2814_v19 = vadd.f32 %v2813_v33, %v2812_v27  ;;  %v2823_v59 = vadd.f32 %v2822_v43, %v2821_v5  ;;  %v2839_v15 = vadd.f32 %v2838_v49, %v2837_v44  ;;  %v2847_v21 = vsel %vm2075_vm1, %v4486_v17, 0.0  ;;  %v4924_v44 = vld [vmem:[#allocation33_spill] sm:$0xff] }
 0x2db   : > { %v2799_v34 = vrot.slane %v2798_v8, 1  ;;  %v2807_v45 = vadd.f32 %v2806_v30, %v2805_v25  ;;  %v2832_v12 = vadd.f32 %v2831_v55, %v2830_v47  ;;  %v2848_v31 = vadd.f32 %v2847_v21, %v2846_v50  ;;  %v4925_v47 = vld [vmem:[#allocation34_spill] sm:$0xff]  ;;  %v4926_v50 = vld [vmem:[#allocation35_spill] sm:$0xff]  ;;  %v4928_v21 = vld [vmem:[#allocation37_spill] sm:$0xff] }
 0x2dc   : > { %v2815_v14 = vrot.slane %v2814_v19, 2  ;;  %v2824_v22 = vrot.slane %v2823_v59, 2  ;;  %v2840_v57 = vrot.slane %v2839_v15, 4  ;;  %v2855_v38 = vsel %vm2075_vm1, %v4489_v4, 0.0 }
 0x2dd   : > { %v2800_v40 = vadd.f32 %v2799_v34, %v2798_v8  ;;  %v2808_v11 = vrot.slane %v2807_v45, 1  ;;  %v2833_v48 = vrot.slane %v2832_v12, 2  ;;  %v2849_v35 = vrot.slane %v2848_v31, 4 }
 0x2de   : > { %v2816_v46 = vadd.f32 %v2815_v14, %v2814_v19  ;;  %v2825_v56 = vadd.f32 %v2824_v22, %v2823_v59  ;;  %v2841_v62 = vadd.f32 %v2840_v57, %v2839_v15  ;;  %v2856_v17 = vsel %vm2075_vm1, %v4492_v23, 0.0  ;;  %v4927_v59 = vld [vmem:[#allocation36_spill] sm:$0xff] }
 0x2df   : > { %v2809_v41 = vadd.f32 %v2808_v11, %v2807_v45  ;;  %v2834_v61 = vadd.f32 %v2833_v48, %v2832_v12  ;;  %v2850_v10 = vadd.f32 %v2849_v35, %v2848_v31  ;;  %v2857_v7 = vadd.f32 %v2856_v17, %v2855_v38  ;;  %v4930_v12 = vld [vmem:[#allocation39_spill] sm:$0xff]  ;;  %v4931_v22 = vld [vmem:[#allocation40_spill] sm:$0xff]  ;;  %v4933_v48 = vld [vmem:[#allocation42_spill] sm:$0xff] }
 0x2e0   : > { %v2817_v27 = vrot.slane %v2816_v46, 1  ;;  %v2826_v5 = vrot.slane %v2825_v56, 1  ;;  %v2842_v42 = vrot.slane %v2841_v62, 2  ;;  %v4558_v4 = vadd.f32 %v4510_v2, %v4924_v44  ;;  %v4934_v35 = vld [vmem:[#allocation43_spill] sm:$0xff]  ;;  %v4936_v17 = vld [vmem:[#allocation45_spill] sm:$0xff] }
 0x2e1   : > { %v2835_v18 = vrot.slane %v2834_v61, 1  ;;  %v2851_v51 = vrot.slane %v2850_v10, 2  ;;  %v2858_v25 = vrot.slane %v2857_v7, 4  ;;  %v4562_v33 = vadd.f32 %v4512_v39, %v4925_v47  ;;  %v4929_v39 = vld [vmem:[#allocation38_spill] sm:$0xff] }
 0x2e2   : > { %v2818_v43 = vadd.f32 %v2817_v27, %v2816_v46  ;;  %v2827_v23 = vadd.f32 %v2826_v5, %v2825_v56  ;;  %v2843_v49 = vadd.f32 %v2842_v42, %v2841_v62  ;;  %v4566_v8 = vadd.f32 %v4514_v28, %v4926_v50  ;;  %v4938_v42 = vld [vmem:[#allocation47_spill] sm:$0xff] }
 0x2e3   : > { %v2836_v30 = vadd.f32 %v2835_v18, %v2834_v61  ;;  %v2852_v55 = vadd.f32 %v2851_v51, %v2850_v10  ;;  %v2859_v19 = vadd.f32 %v2858_v25, %v2857_v7  ;;  %v4570_v2 = vadd.f32 %v4516_v63, %v4927_v59  ;;  %v4932_v63 = vld [vmem:[#allocation41_spill] sm:$0xff] }
 0x2e4   : > { %v2844_v15 = vrot.slane %v2843_v49, 1  ;;  %v4574_v34 = vadd.f32 %v4522_v60, %v4928_v21  ;;  %v4578_v45 = vadd.f32 %v4524_v13, %v4929_v39  ;;  %v4582_v28 = vadd.f32 %v4540_v54, %v4930_v12  ;;  %v4935_v13 = vld [vmem:[#allocation44_spill] sm:$0xff] }
 0x2e5   : > { %v2853_v31 = vrot.slane %v2852_v55, 1  ;;  %v2860_v14 = vrot.slane %v2859_v19, 2  ;;  %v4585_v57 = vadd.f32 %v2791_v53, %v4931_v22  ;;  %v4588_v38 = vadd.f32 %v2800_v40, %v4932_v63  ;;  %v4937_v40 = vld [vmem:[#allocation46_spill] sm:$0xff]  ;;  %v4939_v39 = vld [vmem:[#allocation48_spill] sm:$0xff] }
 0x2e6   : > { %v2845_v11 = vadd.f32 %v2844_v15, %v2843_v49  ;;  %v4591_v60 = vadd.f32 %v2809_v41, %v4933_v48  ;;  %v4594_v46 = vadd.f32 %v2818_v43, %v4934_v35  ;;  %v4597_v56 = vadd.f32 %v2827_v23, %v4935_v13 }
 0x2e7   : > { %v2854_v54 = vadd.f32 %v2853_v31, %v2852_v55  ;;  %v2861_v62 = vadd.f32 %v2860_v14, %v2859_v19  ;;  %v4600_v61 = vadd.f32 %v2836_v30, %v4936_v17  ;;  %v2880_v53 = vsel %vm2075_vm1, %v4558_v4, -inf }
 0x2e8   : > { %v4605_v10 = vadd.f32 %v2845_v11, %v4937_v40  ;;  %v2881_v41 = vsel %vm2075_vm1, %v4562_v33, -inf  ;;  %v2882_v7 = vsel %vm2075_vm1, %v4566_v8, -inf  ;;  %v2883_v27 = vsel %vm2075_vm1, %v4570_v2, -inf }
 0x2e9   : > { %v2862_v5 = vrot.slane %v2861_v62, 1  ;;  %v4614_v44 = vadd.f32 %v2854_v54, %v4938_v42  ;;  %v2884_v18 = vsel %vm2075_vm1, %v4574_v34, -inf  ;;  %v2886_v51 = vsel %vm2075_vm1, %v4578_v45, -inf }
 0x2ea   : > { %v2885_v25 = vmax.f32 %v2880_v53, %v2884_v18  ;;  %v2887_v47 = vmax.f32 %v2881_v41, %v2886_v51  ;;  %v2888_v43 = vsel %vm2075_vm1, %v4582_v28, -inf  ;;  %v2890_v23 = vsel %vm2075_vm1, %v4585_v57, -inf }
 0x2eb   : > { %v2863_v49 = vadd.f32 %v2862_v5, %v2861_v62  ;;  %v2889_v50 = vmax.f32 %v2882_v7, %v2888_v43  ;;  %v2891_v30 = vmax.f32 %v2883_v27, %v2890_v23  ;;  %v2892_v55 = vsel %vm2075_vm1, %v4588_v38, -inf }
 0x2ec   : > { %v2893_v19 = vmax.f32 %v2885_v25, %v2892_v55  ;;  %v2894_v59 = vsel %vm2075_vm1, %v4591_v60, -inf  ;;  %v2896_v15 = vsel %vm2075_vm1, %v4594_v46, -inf  ;;  %v2898_v21 = vsel %vm2075_vm1, %v4597_v56, -inf }
 0x2ed   : > { %v2879_v12 = vadd.f32 %v2863_v49, %v4939_v39  ;;  %v2895_v31 = vmax.f32 %v2887_v47, %v2894_v59  ;;  %v2897_v14 = vmax.f32 %v2889_v50, %v2896_v15  ;;  %v2899_v22 = vmax.f32 %v2891_v30, %v2898_v21 }
 0x2ee   : > { %v2900_v63 = vsel %vm2075_vm1, %v4600_v61, -inf  ;;  %v2902_v11 = vsel %vm2075_vm1, %v4605_v10, -inf  ;;  %v2904_v48 = vsel %vm2075_vm1, %v4614_v44, -inf }
 0x2ef   : > { %v2901_v35 = vmax.f32 %v2893_v19, %v2900_v63  ;;  %v2903_v13 = vmax.f32 %v2895_v31, %v2902_v11  ;;  %v2905_v54 = vmax.f32 %v2897_v14, %v2904_v48  ;;  %v2906_v62 = vsel %vm2075_vm1, %v2879_v12, -inf }
 0x2f0   : > { %v2907_v17 = vmax.f32 %v2899_v22, %v2906_v62 }
 0x2f1   : > { %v2908_v53 = vmax.f32 %v2901_v35, %v2903_v13 }
 0x2f2   : > { %v2909_v40 = vmax.f32 %v2905_v54, %v2907_v17 }
 0x2f4   : > { %v2910_v41 = vmax.f32 %v2908_v53, %v2909_v40 }
 0x2f6   : > { %v2911_v7 = vsub.f32 %v4558_v4, %v2910_v41  ;;  %v2912_v27 = vsub.f32 %v4562_v33, %v2910_v41  ;;  %v2913_v5 = vsub.f32 %v4566_v8, %v2910_v41  ;;  %v2914_v42 = vsub.f32 %v4570_v2, %v2910_v41 }
 0x2f7   : > { %v2915_v18 = vsub.f32 %v4574_v34, %v2910_v41  ;;  %v2916_v51 = vsub.f32 %v4578_v45, %v2910_v41  ;;  %v2917_v25 = vsub.f32 %v4582_v28, %v2910_v41  ;;  %v2918_v47 = vsub.f32 %v4585_v57, %v2910_v41 }
 0x2f8   : > { %v2919_v43 = vsub.f32 %v4588_v38, %v2910_v41  ;;  %v2920_v23 = vsub.f32 %v4591_v60, %v2910_v41  ;;  %v2921_v4 = vsub.f32 %v4594_v46, %v2910_v41  ;;  %v2922_v33 = vsub.f32 %v4597_v56, %v2910_v41 }
 0x2f9   : > { %v2923_v8 = vsub.f32 %v4600_v61, %v2910_v41  ;;  %v2924_v2 = vsub.f32 %v4605_v10, %v2910_v41  ;;  %v2925_v34 = vsub.f32 %v4614_v44, %v2910_v41  ;;  %v2926_v49 = vsub.f32 %v2879_v12, %v2910_v41 }
 0x2fa   : > { %v2927_v45 = vmul.f32 1.442695, %v2911_v7  ;;  %v2929_v50 = vmul.f32 1.442695, %v2912_v27  ;;  %v2931_v28 = vmul.f32 1.442695, %v2913_v5 }
 0x2fb   : > { %v2933_v30 = vmul.f32 1.442695, %v2914_v42  ;;  %v2935_v57 = vmul.f32 1.442695, %v2915_v18  ;;  %v2937_v38 = vmul.f32 1.442695, %v2916_v51 }
 0x2fc   : > { %3594 = vpow2.f32 %v2927_v45  ;;  %v2939_v60 = vmul.f32 1.442695, %v2917_v25  ;;  %v2941_v46 = vmul.f32 1.442695, %v2918_v47  ;;  %v2943_v56 = vmul.f32 1.442695, %v2919_v43 }
 0x2fd   : > { %3596 = vpow2.f32 %v2929_v50  ;;  %v2945_v61 = vmul.f32 1.442695, %v2920_v23  ;;  %v2947_v10 = vmul.f32 1.442695, %v2921_v4  ;;  %v2949_v44 = vmul.f32 1.442695, %v2922_v33 }
 0x2fe   : > { %3598 = vpow2.f32 %v2931_v28  ;;  %v2951_v55 = vmul.f32 1.442695, %v2923_v8  ;;  %v2953_v19 = vmul.f32 1.442695, %v2924_v2  ;;  %v2955_v15 = vmul.f32 1.442695, %v2925_v34 }
 0x2ff   : > { %3600 = vpow2.f32 %v2933_v30  ;;  %v2957_v39 = vmul.f32 1.442695, %v2926_v49 }
 0x300   : > { %3602 = vpow2.f32 %v2935_v57 }
 0x301   : > { %3604 = vpow2.f32 %v2937_v38 }
 0x302   : > { %3606 = vpow2.f32 %v2939_v60 }
 0x303   : > { %3608 = vpow2.f32 %v2941_v46 }
 0x304   : > { %3610 = vpow2.f32 %v2943_v56 }
 0x305   : > { %3612 = vpow2.f32 %v2945_v61 }
 0x306   : > { %v4655_v59 = vpop.eup %3594  ;;  %3614 = vpow2.f32 %v2947_v10 }
 0x307   : > { %v3597_v21 = vpop.eup %3596  ;;  %3616 = vpow2.f32 %v2949_v44 }
 0x308   : > { %v3599_v12 = vpop.eup %3598  ;;  %3618 = vpow2.f32 %v2951_v55  ;;  %v2975_v31 = vrot.slane %v3597_v21, 7 }
 0x309   : > { %v3601_v14 = vpop.eup %3600  ;;  %3620 = vpow2.f32 %v2953_v19  ;;  %v2977_v22 = vrot.slane %v3599_v12, 6 }
 0x30a   : > { %v3603_v63 = vpop.eup %3602  ;;  %3622 = vpow2.f32 %v2955_v15  ;;  %v2976_v11 = vsel %vm2445_vm2, %v2975_v31, %v4655_v59  ;;  %v2979_v48 = vrot.slane %v3601_v14, 5 }
 0x30b   : > { %v3605_v35 = vpop.eup %3604  ;;  %3624 = vpow2.f32 %v2957_v39  ;;  %v2978_v13 = vsel %vm2448_vm3, %v2977_v22, %v2976_v11  ;;  %v2981_v54 = vrot.slane %v3603_v63, 4 }
 0x30c   : > { %v3607_v62 = vpop.eup %3606  ;;  %v2980_v17 = vsel %vm2451_vm4, %v2979_v48, %v2978_v13  ;;  %v2983_v53 = vrot.slane %v3605_v35, 3 }
 0x30d   : > { %v3609_v40 = vpop.eup %3608  ;;  %v2982_v41 = vsel %vm2454_vm5, %v2981_v54, %v2980_v17  ;;  %v2985_v7 = vrot.slane %v3607_v62, 2  ;;  %v4940_v54 = vld [vmem:[#allocation49_spill] sm:$0xff] }
 0x30e   : > { %v3611_v27 = vpop.eup %3610  ;;  %v2984_v5 = vsel %vm2457_vm6, %v2983_v53, %v2982_v41  ;;  %v2987_v42 = vrot.slane %v3609_v40, 1 }
 0x30f   : > { %v3613_v18 = vpop.eup %3612  ;;  %v2986_v51 = vsel %vm2460_vm7, %v2985_v7, %v2984_v5 }
 0x310   : > { %v3615_v25 = vpop.eup %3614  ;;  %v2988_v47 = vsel %vm2463_vm8, %v2987_v42, %v2986_v51  ;;  %v2989_v43 = vrot.slane %v3613_v18, 7 }
 0x311   : > { %v3617_v23 = vpop.eup %3616  ;;  %v2991_v4 = vrot.slane %v3615_v25, 6  ;;  %v3005_v10 = vsel %vm2075_vm1, %v2988_v47, 0.0 }
 0x312   : > { %v3619_v33 = vpop.eup %3618  ;;  %v2990_v8 = vsel %vm2445_vm2, %v2989_v43, %v3611_v27  ;;  %v2993_v2 = vrot.slane %v3617_v23, 5 }
 0x313   : > { %v3621_v34 = vpop.eup %3620  ;;  %v2992_v49 = vsel %vm2448_vm3, %v2991_v4, %v2990_v8  ;;  %v2995_v45 = vrot.slane %v3619_v33, 4 }
 0x314   : > { %v3623_v50 = vpop.eup %3622  ;;  %v2994_v28 = vsel %vm2451_vm4, %v2993_v2, %v2992_v49  ;;  %v2997_v30 = vrot.slane %v3621_v34, 3 }
 0x315   : > { %v3625_v57 = vpop.eup %3624  ;;  %v2996_v38 = vsel %vm2454_vm5, %v2995_v45, %v2994_v28  ;;  %v2999_v60 = vrot.slane %v3623_v50, 2 }
 0x316   : > { %v2998_v46 = vsel %vm2457_vm6, %v2997_v30, %v2996_v38  ;;  %v3001_v56 = vrot.slane %v3625_v57, 1 }
 0x317   : > { %v3000_v61 = vsel %vm2460_vm7, %v2999_v60, %v2998_v46 }
 0x318   : > { %v3002_v44 = vsel %vm2463_vm8, %v3001_v56, %v3000_v61 }
 0x319   : > { %v3006_v55 = vsel %vm2075_vm1, %v3002_v44, 0.0 }
 0x31a   : > { %v3007_v19 = vadd.f32 %v3006_v55, %v3005_v10 }
 0x31c   : > { %v3008_v15 = vrot.slane %v3007_v19, 4 }
 0x31e   : > { %v3009_v39 = vadd.f32 %v3008_v15, %v3007_v19 }
 0x320   : > { %v3010_v31 = vrot.slane %v3009_v39, 2 }
 0x322   : > { %v3011_v22 = vadd.f32 %v3010_v31, %v3009_v39  ;;  %v4941_v31 = vld [vmem:[#allocation14_spill] sm:$0xff] }
 0x324   : > { %v3012_v11 = vrot.slane %v3011_v22, 1 }
 0x326   : > { %v3013_v48 = vadd.f32 %v3012_v11, %v3011_v22  ;;  %v4942_v22 = vld [vmem:[#allocation19_spill] sm:$0xff]  ;;  %v4943_v11 = vld [vmem:[#allocation17_spill] sm:$0xff] }
 0x328   : > { %3626 = vrcp.f32 %v3013_v48  ;;  %v4944_v48 = vld [vmem:[#allocation20_spill] sm:$0xff] }
 0x332   : > { %v3627_v13 = vpop.eup %3626 }
 0x333   : > { %v3018_v17 = vrot.slane %v3627_v13, %v4940_v54  ;;  %v4945_v13 = vld [vmem:[#allocation18_spill] sm:$0xff] }
 0x335   : > { %v3019_v53 = vmul.f32 %v4655_v59, %v3018_v17  ;;  %v3020_v41 = vmul.f32 %v3597_v21, %v3018_v17  ;;  %v3021_v7 = vmul.f32 %v3599_v12, %v3018_v17  ;;  %v3022_v5 = vmul.f32 %v3601_v14, %v3018_v17 }
 0x336   : > { %v3023_v42 = vmul.f32 %v3603_v63, %v3018_v17  ;;  %v3024_v51 = vmul.f32 %v3605_v35, %v3018_v17  ;;  %v3025_v47 = vmul.f32 %v3607_v62, %v3018_v17  ;;  %v3026_v43 = vmul.f32 %v3609_v40, %v3018_v17 }
 0x337   : > { %v3027_v4 = vmul.f32 %v3611_v27, %v3018_v17  ;;  %v3028_v8 = vmul.f32 %v3613_v18, %v3018_v17  ;;  %v3029_v2 = vmul.f32 %v3615_v25, %v3018_v17  ;;  %v3030_v49 = vmul.f32 %v3617_v23, %v3018_v17 }
 0x338   : > { %v3031_v45 = vmul.f32 %v3619_v33, %v3018_v17  ;;  %v3032_v28 = vmul.f32 %v3621_v34, %v3018_v17  ;;  %v3033_v30 = vmul.f32 %v3623_v50, %v3018_v17  ;;  %v3034_v38 = vmul.f32 %v3625_v57, %v3018_v17  ;;  %v4947_v17 = vld [vmem:[#allocation21_spill] sm:$0xff] }
 0x339   : > { %v3038_v60 = vrot.slane %v3019_v53, %v4940_v54  ;;  %v3042_v46 = vrot.slane %v3020_v41, %v4940_v54  ;;  %v3046_v59 = vrot.slane %v3021_v7, %v4940_v54  ;;  %v3050_v21 = vrot.slane %v3022_v5, %v4940_v54  ;;  %v4948_v53 = vld [vmem:[#allocation24_spill] sm:$0xff]  ;;  %v4949_v41 = vld [vmem:[#allocation22_spill] sm:$0xff]  ;;  %v4950_v7 = vld [vmem:[#allocation27_spill] sm:$0xff] }
 0x33a   : > { %v3054_v12 = vrot.slane %v3023_v42, %v4940_v54  ;;  %v3058_v14 = vrot.slane %v3024_v51, %v4940_v54  ;;  %v3062_v63 = vrot.slane %v3025_v47, %v4940_v54  ;;  %v3066_v35 = vrot.slane %v3026_v43, %v4940_v54  ;;  %v4951_v5 = vld [vmem:[#allocation25_spill] sm:$0xff]  ;;  %v4952_v51 = vld [vmem:[#allocation28_spill] sm:$0xff]  ;;  %v4953_v43 = vld [vmem:[#allocation26_spill] sm:$0xff] }
 0x33b   : > { %v3070_v62 = vrot.slane %v3027_v4, %v4940_v54  ;;  %v3074_v40 = vrot.slane %v3028_v8, %v4940_v54  ;;  %v3078_v27 = vrot.slane %v3029_v2, %v4940_v54  ;;  %v3082_v18 = vrot.slane %v3030_v49, %v4940_v54  ;;  %v4954_v8 = vld [vmem:[#allocation31_spill] sm:$0xff]  ;;  %v4955_v49 = vld [vmem:[#allocation29_spill] sm:$0xff] }
 0x33c   : > { %v3086_v25 = vrot.slane %v3031_v45, %v4940_v54  ;;  %v3090_v23 = vrot.slane %v3032_v28, %v4940_v54  ;;  %v3094_v33 = vrot.slane %v3033_v30, %v4940_v54  ;;  %v3098_v34 = vrot.slane %v3034_v38, %v4940_v54  ;;  %v4946_v54 = vld [vmem:[#allocation23_spill] sm:$0xff]  ;;  %v4956_v28 = vld [vmem:[#allocation32_spill] sm:$0xff]  ;;  %v4957_v38 = vld [vmem:[#allocation30_spill] sm:$0xff] }
 0x33d   : > { %v3099_v50 = vmul.f32 %v3038_v60, %v3933_v1  ;;  %v3100_v57 = vmul.f32 %v3931_v0, %v3038_v60  ;;  %v3101_v56 = vmul.f32 %v3042_v46, %v3945_v9  ;;  %v3102_v61 = vmul.f32 %v4905_v29, %v3042_v46 }
 0x33e   : > { %v3103_v10 = vmul.f32 %v3046_v59, %v3937_v3  ;;  %v3104_v44 = vmul.f32 %v4907_v52, %v3046_v59  ;;  %v3105_v55 = vmul.f32 %v3050_v21, %v4906_v20  ;;  %v3106_v19 = vmul.f32 %v4909_v6, %v3050_v21 }
 0x33f   : > { %v3107_v15 = vmul.f32 %v3054_v12, %v4908_v37  ;;  %v3108_v39 = vmul.f32 %v4911_v24, %v3054_v12  ;;  %v3109_v1 = vmul.f32 %v3058_v14, %v4910_v36  ;;  %v3110_v0 = vmul.f32 %v4913_v16, %v3058_v14 }
 0x340   : > { %v3111_v9 = vmul.f32 %v3062_v63, %v4912_v58  ;;  %v3112_v29 = vmul.f32 %v4915_v26, %v3062_v63  ;;  %v3113_v3 = vmul.f32 %v3066_v35, %v4914_v32  ;;  %v3114_v52 = vmul.f32 %v4941_v31, %v3066_v35 }
 0x341   : > { %v3115_v20 = vmul.f32 %v3070_v62, %v4942_v22  ;;  %v3116_v6 = vmul.f32 %v4943_v11, %v3070_v62  ;;  %v3117_v37 = vmul.f32 %v3074_v40, %v4944_v48  ;;  %v3118_v24 = vmul.f32 %v4945_v13, %v3074_v40 }
 0x342   : > { %v3119_v36 = vmul.f32 %v3078_v27, %v4946_v54  ;;  %v3120_v16 = vmul.f32 %v4947_v17, %v3078_v27  ;;  %v3121_v58 = vmul.f32 %v3082_v18, %v4948_v53  ;;  %v3122_v26 = vmul.f32 %v4949_v41, %v3082_v18 }
 0x343   : > { %v3123_v32 = vmul.f32 %v3086_v25, %v4950_v7  ;;  %v3124_v42 = vmul.f32 %v4951_v5, %v3086_v25  ;;  %v3125_v47 = vmul.f32 %v3090_v23, %v4952_v51  ;;  %v3126_v4 = vmul.f32 %v4953_v43, %v3090_v23 }
 0x344   : > { %v3127_v2 = vmul.f32 %v3094_v33, %v4954_v8  ;;  %v3128_v45 = vmul.f32 %v4955_v49, %v3094_v33  ;;  %v3129_v30 = vmul.f32 %v3098_v34, %v4956_v28  ;;  %v3130_v60 = vmul.f32 %v4957_v38, %v3098_v34 }
 0x345   : > { %v3131_v46 = vsel %vm2075_vm1, %v3099_v50, 0.0  ;;  %v3132_v59 = vsel %vm2075_vm1, %v3101_v56, 0.0  ;;  %v3134_v12 = vsel %vm2075_vm1, %v3103_v10, 0.0  ;;  %v3136_v63 = vsel %vm2075_vm1, %v3105_v55, 0.0 }
 0x346   : > { %v3133_v21 = vadd.f32 %v3132_v59, %v3131_v46  ;;  %v3162_v35 = vsel %vm2075_vm1, %v3100_v57, 0.0  ;;  %v3163_v62 = vsel %vm2075_vm1, %v3102_v61, 0.0  ;;  %v3138_v18 = vsel %vm2075_vm1, %v3107_v15, 0.0 }
 0x347   : > { %v3164_v27 = vadd.f32 %v3163_v62, %v3162_v35  ;;  %v3165_v25 = vsel %vm2075_vm1, %v3104_v44, 0.0  ;;  %v3140_v34 = vsel %vm2075_vm1, %v3109_v1, 0.0  ;;  %v3167_v50 = vsel %vm2075_vm1, %v3106_v19, 0.0 }
 0x348   : > { %v3135_v14 = vadd.f32 %v3134_v12, %v3133_v21  ;;  %v3142_v55 = vsel %vm2075_vm1, %v3111_v9, 0.0  ;;  %v3169_v57 = vsel %vm2075_vm1, %v3108_v39, 0.0  ;;  %v3144_v22 = vsel %vm2075_vm1, %v3113_v3, 0.0 }
 0x349   : > { %v3166_v33 = vadd.f32 %v3165_v25, %v3164_v27  ;;  %v3171_v15 = vsel %vm2075_vm1, %v3110_v0, 0.0  ;;  %v3146_v48 = vsel %vm2075_vm1, %v3115_v20, 0.0  ;;  %v3173_v1 = vsel %vm2075_vm1, %v3112_v29, 0.0 }
 0x34a   : > { %v3137_v40 = vadd.f32 %v3136_v63, %v3135_v14  ;;  %v3148_v54 = vsel %vm2075_vm1, %v3117_v37, 0.0  ;;  %v3175_v9 = vsel %vm2075_vm1, %v3114_v52, 0.0  ;;  %v3150_v53 = vsel %vm2075_vm1, %v3119_v36, 0.0 }
 0x34b   : > { %v3168_v10 = vadd.f32 %v3167_v50, %v3166_v33  ;;  %v3177_v3 = vsel %vm2075_vm1, %v3116_v6, 0.0  ;;  %v3152_v7 = vsel %vm2075_vm1, %v3121_v58, 0.0  ;;  %v3179_v20 = vsel %vm2075_vm1, %v3118_v24, 0.0 }
 0x34c   : > { %v3139_v23 = vadd.f32 %v3138_v18, %v3137_v40  ;;  %v3154_v51 = vsel %vm2075_vm1, %v3123_v32, 0.0  ;;  %v3181_v37 = vsel %vm2075_vm1, %v3120_v16, 0.0  ;;  %v3156_v8 = vsel %vm2075_vm1, %v3125_v47, 0.0 }
 0x34d   : > { %v3170_v61 = vadd.f32 %v3169_v57, %v3168_v10  ;;  %v3183_v36 = vsel %vm2075_vm1, %v3122_v26, 0.0  ;;  %v3158_v28 = vsel %vm2075_vm1, %v3127_v2, 0.0  ;;  %v3185_v58 = vsel %vm2075_vm1, %v3124_v42, 0.0 }
 0x34e   : > { %v3141_v56 = vadd.f32 %v3140_v34, %v3139_v23  ;;  %v3160_v46 = vsel %vm2075_vm1, %v3129_v30, 0.0  ;;  %v3187_v32 = vsel %vm2075_vm1, %v3126_v4, 0.0  ;;  %v3189_v21 = vsel %vm2075_vm1, %v3128_v45, 0.0 }
 0x34f   : > { %v3172_v44 = vadd.f32 %v3171_v15, %v3170_v61  ;;  %v3191_v26 = vsel %vm2075_vm1, %v3130_v60, 0.0 }
 0x350   : > { %v3143_v31 = vadd.f32 %v3142_v55, %v3141_v56 }
 0x351   : > { %v3174_v19 = vadd.f32 %v3173_v1, %v3172_v44 }
 0x352   : > { %v3145_v11 = vadd.f32 %v3144_v22, %v3143_v31 }
 0x353   : > { %v3176_v39 = vadd.f32 %v3175_v9, %v3174_v19 }
 0x354   : > { %v3147_v13 = vadd.f32 %v3146_v48, %v3145_v11 }
 0x355   : > { %v3178_v0 = vadd.f32 %v3177_v3, %v3176_v39 }
 0x356   : > { %v3149_v17 = vadd.f32 %v3148_v54, %v3147_v13 }
 0x357   : > { %v3180_v29 = vadd.f32 %v3179_v20, %v3178_v0 }
 0x358   : > { %v3151_v41 = vadd.f32 %v3150_v53, %v3149_v17 }
 0x359   : > { %v3182_v52 = vadd.f32 %v3181_v37, %v3180_v29 }
 0x35a   : > { %v3153_v5 = vadd.f32 %v3152_v7, %v3151_v41 }
 0x35b   : > { %v3184_v6 = vadd.f32 %v3183_v36, %v3182_v52 }
 0x35c   : > { %v3155_v43 = vadd.f32 %v3154_v51, %v3153_v5 }
 0x35d   : > { %v3186_v24 = vadd.f32 %v3185_v58, %v3184_v6 }
 0x35e   : > { %v3157_v49 = vadd.f32 %v3156_v8, %v3155_v43 }
 0x35f   : > { %v3188_v16 = vadd.f32 %v3187_v32, %v3186_v24 }
 0x360   : > { %v3159_v38 = vadd.f32 %v3158_v28, %v3157_v49 }
 0x361   : > { %v3190_v12 = vadd.f32 %v3189_v21, %v3188_v16 }
 0x362   : > { %v3161_v59 = vadd.f32 %v3160_v46, %v3159_v38 }
 0x363   : > { %v3192_v14 = vadd.f32 %v3191_v26, %v3190_v12 }
 0x364   : > { %v3193_v47 = vmul.f32 %v3161_v59, %v3161_v59 }
 0x365   : > { %v3194_v2 = vmul.f32 %v3192_v14, %v3192_v14 }
 0x366   : > { %v3195_v42 = vsel %vm2075_vm1, %v3193_v47, 0.0 }
 0x367   : > { %v3196_v63 = vsel %vm2075_vm1, %v3194_v2, 0.0 }
 0x368   : > { %v3197_v35 = vadd.f32 %v3196_v63, %v3195_v42 }
 0x36a   : > { %v3198_v30 = vrot.slane %v3197_v35, 4 }
 0x36c   : > { %v3199_v62 = vadd.f32 %v3198_v30, %v3197_v35 }
 0x36e   : > { %v3200_v4 = vrot.slane %v3199_v62, 2 }
 0x370   : > { %v3201_v40 = vadd.f32 %v3200_v4, %v3199_v62 }
 0x372   : > { %v3202_v27 = vrot.slane %v3201_v40, 1 }
 0x374   : > { %v3203_v18 = vadd.f32 %v3202_v27, %v3201_v40 }
 0x376   : > { %3628 = vrsqrt.f32 %v3203_v18  ;;  %v3208_v45 = vadd.f32 1.0, %v3203_v18 }
 0x378   : > { %3630 = vrcp.f32 %v3208_v45 }
 0x380   : > { %v3629_v60 = vpop.eup %3628 }
 0x381   : > { %v3205_v25 = vmul.f32 %v3629_v60, %v3203_v18 }
 0x382   : > { %v3631_v34 = vpop.eup %3630 }
 0x383   : > { %v3206_v23 = vmul.f32 %v3205_v25, %v3161_v59  ;;  %v3207_v33 = vmul.f32 %v3205_v25, %v3192_v14 }
 0x385   : > { %v3210_v50 = vmul.f32 %v3631_v34, %v3206_v23  ;;  %v3211_v56 = vmul.f32 %v3631_v34, %v3207_v33 }
 0x387   : > { %3212 = vst.msk [vmem:[%s200_s19] sm:$0xff] %vm2075_vm1, %v3210_v50  ;;  %3213 = vst.msk [vmem:[%s200_s19 + $0x8] sm:$0xff] %vm2075_vm1, %v3211_v56 }
 0x388 PF: > { %s15_s14 = sadd.s32 1, %s3712_s14   ;;  %s4958_s9 = smov %s3696_s10 }
 0x389   : > { %p12_p9 = scmp.ge.s32.totalorder %s15_s14, 6   ;;  %s4959_s10 = smov %s3700_s11 }
 0x38a   : > { %s4960_s11 = smov %s3781_s21  ;;  %s4961_s12 = smov %s3708_s13 }
 0x38b   : > { %s4962_s13 = smov %s4964_s16  ;;  %14 = sbr.rel (!%p12_p9) target bundleno = 4 (0x4), region = 71 }
 0x392   :  { %3241 = vsyncpa [#allocation3], 1 }
 0x393   :  { %3243 = vsyncpa [#allocation3 + $0x1], 1 }

</bundles_post_ra>
